<compile_context>
chip_gen: v6e
topology: v6e:2x2x1
jax: 0.10.0
libtpu: 0.0.40
codegen_flags: <defaults>
</compile_context>

<pallas_src>
import functools

import jax
import jax.numpy as jnp
from jax.experimental import pallas as pl
from jax.experimental.pallas import tpu as pltpu


_MASK_VALUE = -1e30  # large finite negative: exp() underflows to 0, no NaN risk


# ----------------------------------------------------------------------------
# Parameter packing shared by the kernel wrapper and the mixed-precision ref.
# Folds the hd**-0.5 scale into Wq / bq and casts weights to bf16 (MXU operands).
# ----------------------------------------------------------------------------
def _pack_params(w_qkv, b_qkv):
    hd = w_qkv.shape[-1]
    scale = jnp.array([hd ** -0.5, 1.0, 1.0], jnp.float32)
    w_packed = (w_qkv.astype(jnp.float32) * scale[:, None, None]).astype(jnp.bfloat16)
    b_packed = (b_qkv.astype(jnp.float32) * scale[:, None])           # stays f32
    return w_packed, b_packed


# ----------------------------------------------------------------------------
# Fused attention kernel: `cb` batch elements per grid step.
# ----------------------------------------------------------------------------
def attention_kernel(q_ref, k_ref, v_ref, w_ref, b_ref, o_ref, *, causal):
    cb, S, E = q_ref.shape
    hd = w_ref.shape[-1]

    # ---- Q/K/V projections: bf16 operands, f32 accumulation, M = cb*S -------
    q2 = q_ref[...].reshape(cb * S, E).astype(jnp.bfloat16)
    k2 = k_ref[...].reshape(cb * S, E).astype(jnp.bfloat16)
    v2 = v_ref[...].reshape(cb * S, E).astype(jnp.bfloat16)

    qp = jnp.dot(q2, w_ref[0], preferred_element_type=jnp.float32) + b_ref[0:1, :]
    kp = jnp.dot(k2, w_ref[1], preferred_element_type=jnp.float32) + b_ref[1:2, :]
    vp = jnp.dot(v2, w_ref[2], preferred_element_type=jnp.float32) + b_ref[2:3, :]

    qp = qp.reshape(cb, S, hd).astype(jnp.bfloat16)   # scale already folded into Wq/bq
    kp = kp.reshape(cb, S, hd).astype(jnp.bfloat16)
    vp = vp.reshape(cb, S, hd).astype(jnp.bfloat16)

    # ---- scores: contract last dims directly (no kp.T / XLU transpose) ------
    wei = jnp.einsum("bqd,bkd->bqk", qp, kp,
                     preferred_element_type=jnp.float32)              # (cb, S, S) f32

    if causal:
        row = jax.lax.broadcasted_iota(jnp.int32, (cb, S, S), 1)
        col = jax.lax.broadcasted_iota(jnp.int32, (cb, S, S), 2)
        wei = jnp.where(row >= col, wei, _MASK_VALUE)
    # TODO(synk): arbitrary (non-causal) dense masks would need an explicit
    # boolean mask input block.

    # ---- softmax with deferred, exact normalization --------------------------
    m = jnp.max(wei, axis=-1, keepdims=True)
    p = jnp.exp(wei - m)                               # unnormalized probabilities
    denom = jnp.sum(p, axis=-1, keepdims=True)         # (cb, S, 1)

    o = jnp.einsum("bqk,bkd->bqd", p.astype(jnp.bfloat16), vp,
                   preferred_element_type=jnp.float32)
    o = o / denom                                       # exact divide on (cb,S,hd)
    o_ref[...] = o.astype(o_ref.dtype)

    # TODO(synk): for very long S (v7x, 64 MiB VMEM) tile the KV axis with an
    # online-softmax (flash-style) accumulator instead of holding (S,S) scores.


# ----------------------------------------------------------------------------
# Wrapper
# ----------------------------------------------------------------------------
@functools.partial(jax.jit, static_argnames=("causal",))
def attention(q, k, v, w_qkv, b_qkv, causal=True):
    """Pallas implementation of Attention.forward.

    q, k, v : (B, S, E) float32
    w_qkv   : (3, E, head_dim)   stacked [Wq, Wk, Wv] in "x @ W" orientation
    b_qkv   : (3, head_dim)      stacked [bq, bk, bv]
    returns : (B, S, head_dim) float32
    """
    B, S, E = q.shape
    hd = w_qkv.shape[-1]

    w_p, b_p = _pack_params(w_qkv, b_qkv)

    cb = 2 if B % 2 == 0 else 1          # >=2 batch rows/step fills v6e/v7x MXU depth
    kernel = functools.partial(attention_kernel, causal=causal)

    return pl.pallas_call(
        kernel,
        out_shape=jax.ShapeDtypeStruct((B, S, hd), jnp.float32),
        grid_spec=pltpu.PrefetchScalarGridSpec(
            num_scalar_prefetch=0,
            grid=(B // cb,),
            in_specs=[
                pl.BlockSpec((cb, S, E), lambda b: (b, 0, 0)),   # q
                pl.BlockSpec((cb, S, E), lambda b: (b, 0, 0)),   # k
                pl.BlockSpec((cb, S, E), lambda b: (b, 0, 0)),   # v
                pl.BlockSpec((3, E, hd), lambda b: (0, 0, 0)),   # bf16 weights (scale folded)
                pl.BlockSpec((3, hd), lambda b: (0, 0)),         # f32 biases
            ],
            out_specs=pl.BlockSpec((cb, S, hd), lambda b: (b, 0, 0)),
        ),
        compiler_params=pltpu.CompilerParams(
            dimension_semantics=("parallel",)),
    )(q, k, v, w_p, b_p)


# ----------------------------------------------------------------------------
# References
# ----------------------------------------------------------------------------
def reference_mixed(q, k, v, w_qkv, b_qkv, causal=True):
    """Mirrors the kernel's numerics (bf16 MXU operands, f32 accumulation)."""
    w_p, b_p = _pack_params(w_qkv, b_qkv)

    def proj(x, i):
        y = jnp.einsum("bse,ed->bsd", x.astype(jnp.bfloat16), w_p[i],
                       preferred_element_type=jnp.float32)
        return y + b_p[i][None, None, :]

    qp = proj(q, 0).astype(jnp.bfloat16)
    kp = proj(k, 1).astype(jnp.bfloat16)
    vp = proj(v, 2).astype(jnp.bfloat16)

    wei = jnp.einsum("bqd,bkd->bqk", qp, kp, preferred_element_type=jnp.float32)
    if causal:
        S = q.shape[1]
        mask = jnp.tril(jnp.ones((S, S), bool))
        wei = jnp.where(mask[None], wei, _MASK_VALUE)
    m = jnp.max(wei, axis=-1, keepdims=True)
    p = jnp.exp(wei - m)
    o = jnp.einsum("bqk,bkd->bqd", p.astype(jnp.bfloat16), vp,
                   preferred_element_type=jnp.float32)
    return o / jnp.sum(p, axis=-1, keepdims=True)


def reference_f32(q, k, v, w_qkv, b_qkv):
    """Pure-f32 equivalent of the PyTorch module (mask = tril(ones))."""
    hp = jax.lax.Precision.HIGHEST
    qp = jnp.einsum("bse,ed->bsd", q, w_qkv[0], precision=hp) + b_qkv[0]
    kp = jnp.einsum("bse,ed->bsd", k, w_qkv[1], precision=hp) + b_qkv[1]
    vp = jnp.einsum("bse,ed->bsd", v, w_qkv[2], precision=hp) + b_qkv[2]
    d_k = kp.shape[-1]
    wei = jnp.einsum("bsd,btd->bst", qp, kp, precision=hp) * (d_k ** -0.5)
    S = q.shape[1]
    mask = jnp.tril(jnp.ones((S, S), jnp.float32))
    wei = jnp.where(mask == 0, -jnp.inf, wei)
    attn = jax.nn.softmax(wei, axis=-1)
    return jnp.einsum("bst,btd->bsd", attn, vp, precision=hp)


if __name__ == "__main__":
    # Small shapes consistent with the module (n_embd=128); lane-dense last dims.
    B, S, E = 4, 128, 128
    head_dim = 128

    key = jax.random.PRNGKey(0)
    keys = jax.random.split(key, 5)

    q = jax.random.normal(keys[0], (B, S, E), jnp.float32)
    k = jax.random.normal(keys[1], (B, S, E), jnp.float32)
    v = jax.random.normal(keys[2], (B, S, E), jnp.float32)

    scale = E ** -0.5
    w_qkv = scale * jax.random.normal(keys[3], (3, E, head_dim), jnp.float32)
    b_qkv = scale * jax.random.normal(keys[4], (3, head_dim), jnp.float32)

    out = attention(q, k, v, w_qkv, b_qkv, causal=True)
    out = jax.block_until_ready(out)
    assert out.shape == (B, S, head_dim)

    # Tight check: kernel vs. a JAX reference with identical mixed-precision math.
    ref_mix = reference_mixed(q, k, v, w_qkv, b_qkv, causal=True)
    assert jnp.allclose(out, ref_mix, atol=2e-3, rtol=2e-3), \
        "mismatch vs mixed-precision reference"

    # Loose sanity check: kernel (bf16 MXU operands, f32 accumulation) vs. the
    # pure-f32 PyTorch-equivalent reference, relative Frobenius error.
    ref32 = reference_f32(q, k, v, w_qkv, b_qkv)
    rel = float(jnp.sqrt(jnp.sum((out - ref32) ** 2)) / jnp.sqrt(jnp.sum(ref32 ** 2)))
    assert rel < 5e-2, f"relative error vs f32 reference too large: {rel}"

    print("KERNEL_OK")
</pallas_src>

<mosaic_0001>
module attributes {stable_mosaic.version = 11 : i64} {
  func.func @attention_kernel(%arg0: i32, %arg1: memref<2x128x128xf32, #tpu.memory_space<vmem>>, %arg2: memref<2x128x128xf32, #tpu.memory_space<vmem>>, %arg3: memref<2x128x128xf32, #tpu.memory_space<vmem>>, %arg4: memref<3x128x128xbf16, #tpu.memory_space<vmem>>, %arg5: memref<3x128xf32, #tpu.memory_space<vmem>>, %arg6: memref<2x128x128xf32, #tpu.memory_space<vmem>>) attributes {dimension_semantics = [#tpu.dimension_semantics<parallel>], iteration_bounds = array<i64: 2>, scalar_prefetch = 0 : i64, scratch_operands = 0 : i64, tpu.core_type = #tpu.core_type<tc>, window_params = [{transform_indices = @transform_0, window_bounds = array<i64: 2, 128, 128>}, {transform_indices = @transform_1, window_bounds = array<i64: 2, 128, 128>}, {transform_indices = @transform_2, window_bounds = array<i64: 2, 128, 128>}, {pipeline_mode = #tpu.pipeline_mode<synchronous>, transform_indices = @transform_3, window_bounds = array<i64: 3, 128, 128>}, {pipeline_mode = #tpu.pipeline_mode<synchronous>, transform_indices = @transform_4, window_bounds = array<i64: 3, 128>}, {transform_indices = @transform_5, window_bounds = array<i64: 2, 128, 128>}]} {
    %c0 = arith.constant 0 : index
    %c0_0 = arith.constant 0 : index
    %c0_1 = arith.constant 0 : index
    %0 = vector.load %arg1[%c0, %c0_0, %c0_1] : memref<2x128x128xf32, #tpu.memory_space<vmem>>, vector<2x128x128xf32>
    %1 = vector.shape_cast %0 : vector<2x128x128xf32> to vector<256x128xf32>
    %2 = arith.truncf %1 : vector<256x128xf32> to vector<256x128xbf16>
    %c0_2 = arith.constant 0 : index
    %c0_3 = arith.constant 0 : index
    %c0_4 = arith.constant 0 : index
    %3 = vector.load %arg2[%c0_2, %c0_3, %c0_4] : memref<2x128x128xf32, #tpu.memory_space<vmem>>, vector<2x128x128xf32>
    %4 = vector.shape_cast %3 : vector<2x128x128xf32> to vector<256x128xf32>
    %5 = arith.truncf %4 : vector<256x128xf32> to vector<256x128xbf16>
    %c0_5 = arith.constant 0 : index
    %c0_6 = arith.constant 0 : index
    %c0_7 = arith.constant 0 : index
    %6 = vector.load %arg3[%c0_5, %c0_6, %c0_7] : memref<2x128x128xf32, #tpu.memory_space<vmem>>, vector<2x128x128xf32>
    %7 = vector.shape_cast %6 : vector<2x128x128xf32> to vector<256x128xf32>
    %8 = arith.truncf %7 : vector<256x128xf32> to vector<256x128xbf16>
    %c0_8 = arith.constant 0 : index
    %c0_9 = arith.constant 0 : index
    %c0_10 = arith.constant 0 : index
    %9 = vector.load %arg4[%c0_8, %c0_9, %c0_10] : memref<3x128x128xbf16, #tpu.memory_space<vmem>>, vector<1x128x128xbf16>
    %10 = vector.shape_cast %9 : vector<1x128x128xbf16> to vector<128x128xbf16>
    %cst = arith.constant dense<0.000000e+00> : vector<256x128xf32>
    %11 = tpu.matmul %2, %10, %cst {dimension_numbers = #tpu.dot_dimension_numbers<[1], [0], [0], [1], [0, 0, 1, 1], [], []>} : vector<256x128xbf16>, vector<128x128xbf16>, vector<256x128xf32> -> vector<256x128xf32>
    %c0_11 = arith.constant 0 : index
    %c0_12 = arith.constant 0 : index
    %12 = vector.load %arg5[%c0_11, %c0_12] : memref<3x128xf32, #tpu.memory_space<vmem>>, vector<1x128xf32>
    %13 = vector.broadcast %12 : vector<1x128xf32> to vector<256x128xf32>
    %14 = arith.addf %11, %13 : vector<256x128xf32>
    %c1 = arith.constant 1 : index
    %c0_13 = arith.constant 0 : index
    %c0_14 = arith.constant 0 : index
    %15 = vector.load %arg4[%c1, %c0_13, %c0_14] : memref<3x128x128xbf16, #tpu.memory_space<vmem>>, vector<1x128x128xbf16>
    %16 = vector.shape_cast %15 : vector<1x128x128xbf16> to vector<128x128xbf16>
    %cst_15 = arith.constant dense<0.000000e+00> : vector<256x128xf32>
    %17 = tpu.matmul %5, %16, %cst_15 {dimension_numbers = #tpu.dot_dimension_numbers<[1], [0], [0], [1], [0, 0, 1, 1], [], []>} : vector<256x128xbf16>, vector<128x128xbf16>, vector<256x128xf32> -> vector<256x128xf32>
    %c1_16 = arith.constant 1 : index
    %c0_17 = arith.constant 0 : index
    %18 = vector.load %arg5[%c1_16, %c0_17] : memref<3x128xf32, #tpu.memory_space<vmem>>, vector<1x128xf32>
    %19 = vector.broadcast %18 : vector<1x128xf32> to vector<256x128xf32>
    %20 = arith.addf %17, %19 : vector<256x128xf32>
    %c2 = arith.constant 2 : index
    %c0_18 = arith.constant 0 : index
    %c0_19 = arith.constant 0 : index
    %21 = vector.load %arg4[%c2, %c0_18, %c0_19] : memref<3x128x128xbf16, #tpu.memory_space<vmem>>, vector<1x128x128xbf16>
    %22 = vector.shape_cast %21 : vector<1x128x128xbf16> to vector<128x128xbf16>
    %cst_20 = arith.constant dense<0.000000e+00> : vector<256x128xf32>
    %23 = tpu.matmul %8, %22, %cst_20 {dimension_numbers = #tpu.dot_dimension_numbers<[1], [0], [0], [1], [0, 0, 1, 1], [], []>} : vector<256x128xbf16>, vector<128x128xbf16>, vector<256x128xf32> -> vector<256x128xf32>
    %c2_21 = arith.constant 2 : index
    %c0_22 = arith.constant 0 : index
    %24 = vector.load %arg5[%c2_21, %c0_22] : memref<3x128xf32, #tpu.memory_space<vmem>>, vector<1x128xf32>
    %25 = vector.broadcast %24 : vector<1x128xf32> to vector<256x128xf32>
    %26 = arith.addf %23, %25 : vector<256x128xf32>
    %27 = vector.shape_cast %14 : vector<256x128xf32> to vector<2x128x128xf32>
    %28 = arith.truncf %27 : vector<2x128x128xf32> to vector<2x128x128xbf16>
    %29 = vector.shape_cast %20 : vector<256x128xf32> to vector<2x128x128xf32>
    %30 = arith.truncf %29 : vector<2x128x128xf32> to vector<2x128x128xbf16>
    %31 = vector.shape_cast %26 : vector<256x128xf32> to vector<2x128x128xf32>
    %32 = arith.truncf %31 : vector<2x128x128xf32> to vector<2x128x128xbf16>
    "tpu.trace_start"() <{level = 10 : i32, message = "bqd,bkd->bqk"}> : () -> ()
    %cst_23 = arith.constant dense<0.000000e+00> : vector<2x128x128xf32>
    %33 = tpu.matmul %28, %30, %cst_23 {dimension_numbers = #tpu.dot_dimension_numbers<[2], [2], [1], [1], [0, 0, 0, 1, 1, 1], [0], [0]>} : vector<2x128x128xbf16>, vector<2x128x128xbf16>, vector<2x128x128xf32> -> vector<2x128x128xf32>
    "tpu.trace_stop"() : () -> ()
    %34 = tpu.iota {dimensions = array<i32: 1>} : vector<2x128x128xi32>
    %35 = tpu.iota {dimensions = array<i32: 2>} : vector<2x128x128xi32>
    %36 = arith.cmpi sge, %34, %35 : vector<2x128x128xi32>
    %cst_24 = arith.constant -1.000000e+30 : f32
    %37 = vector.broadcast %cst_24 : f32 to vector<2x128x128xf32>
    %38 = arith.select %36, %33, %37 : vector<2x128x128xi1>, vector<2x128x128xf32>
    %cst_25 = arith.constant dense<0xFF800000> : vector<2x128xf32>
    %39 = vector.multi_reduction <maximumf>, %38, %cst_25 [2] : vector<2x128x128xf32> to vector<2x128xf32>
    %40 = vector.shape_cast %39 : vector<2x128xf32> to vector<2x128x1xf32>
    %41 = vector.broadcast %40 : vector<2x128x1xf32> to vector<2x128x128xf32>
    %42 = arith.subf %38, %41 : vector<2x128x128xf32>
    %43 = math.exp %42 : vector<2x128x128xf32>
    %cst_26 = arith.constant dense<0.000000e+00> : vector<2x128xf32>
    %44 = vector.multi_reduction <add>, %43, %cst_26 [2] : vector<2x128x128xf32> to vector<2x128xf32>
    %45 = vector.shape_cast %44 : vector<2x128xf32> to vector<2x128x1xf32>
    %46 = arith.truncf %43 : vector<2x128x128xf32> to vector<2x128x128xbf16>
    "tpu.trace_start"() <{level = 10 : i32, message = "bqk,bkd->bqd"}> : () -> ()
    %cst_27 = arith.constant dense<0.000000e+00> : vector<2x128x128xf32>
    %47 = tpu.matmul %46, %32, %cst_27 {dimension_numbers = #tpu.dot_dimension_numbers<[2], [1], [1], [2], [0, 0, 0, 1, 1, 2], [0], [0]>} : vector<2x128x128xbf16>, vector<2x128x128xbf16>, vector<2x128x128xf32> -> vector<2x128x128xf32>
    "tpu.trace_stop"() : () -> ()
    %48 = vector.broadcast %45 : vector<2x128x1xf32> to vector<2x128x128xf32>
    %49 = arith.divf %47, %48 : vector<2x128x128xf32>
    %c0_28 = arith.constant 0 : index
    %c0_29 = arith.constant 0 : index
    %c0_30 = arith.constant 0 : index
    %50 = vector.load %arg6[%c0_28, %c0_29, %c0_30] : memref<2x128x128xf32, #tpu.memory_space<vmem>>, vector<2x128x128xf32>
    tpu.vector_store %arg6[%c0_28, %c0_29, %c0_30], %49 {strides = array<i32>} : memref<2x128x128xf32, #tpu.memory_space<vmem>>, vector<2x128x128xf32>,
    return
  }
  func.func @transform_0(%arg0: i32) -> (i32, i32, i32) {
    %c0_i32 = arith.constant 0 : i32
    %c0_i32_0 = arith.constant 0 : i32
    %c0_i32_1 = arith.constant 0 : i32
    return %arg0, %c0_i32, %c0_i32_0 : i32, i32, i32
  }
  func.func @transform_1(%arg0: i32) -> (i32, i32, i32) {
    %c0_i32 = arith.constant 0 : i32
    %c0_i32_0 = arith.constant 0 : i32
    %c0_i32_1 = arith.constant 0 : i32
    return %arg0, %c0_i32, %c0_i32_0 : i32, i32, i32
  }
  func.func @transform_2(%arg0: i32) -> (i32, i32, i32) {
    %c0_i32 = arith.constant 0 : i32
    %c0_i32_0 = arith.constant 0 : i32
    %c0_i32_1 = arith.constant 0 : i32
    return %arg0, %c0_i32, %c0_i32_0 : i32, i32, i32
  }
  func.func @transform_3(%arg0: i32) -> (i32, i32, i32) {
    %c0_i32 = arith.constant 0 : i32
    %c0_i32_0 = arith.constant 0 : i32
    %c0_i32_1 = arith.constant 0 : i32
    %c0_i32_2 = arith.constant 0 : i32
    return %c0_i32, %c0_i32_0, %c0_i32_1 : i32, i32, i32
  }
  func.func @transform_4(%arg0: i32) -> (i32, i32) {
    %c0_i32 = arith.constant 0 : i32
    %c0_i32_0 = arith.constant 0 : i32
    %c0_i32_1 = arith.constant 0 : i32
    return %c0_i32, %c0_i32_0 : i32, i32
  }
  func.func @transform_5(%arg0: i32) -> (i32, i32, i32) {
    %c0_i32 = arith.constant 0 : i32
    %c0_i32_0 = arith.constant 0 : i32
    %c0_i32_1 = arith.constant 0 : i32
    return %arg0, %c0_i32, %c0_i32_0 : i32, i32, i32
  }
}

</mosaic_0001>

<bundles_post_ra>
// kernel: attention.1
= control target key start
LH: loop header
LB: loop body
LE: loop exit
PB: predicated region body
PF: predicated region fallthrough
CT: control target
= control target key end

     0   :  { %10 = vsyncpa [#allocation3], 0  ;;  %s4048_s0 = inlined_call_operand.vmem [shape: f32[4,128,128], index: 0, kind: input, shape index: {}]   ;;  %s4049_s1 = inlined_call_operand.hbm [shape: f32[4,128,128], index: 1, kind: input, shape index: {}]   ;;  %s4050_s2 = inlined_call_operand.hbm [shape: f32[4,128,128], index: 2, kind: input, shape index: {}]   ;;  %s4051_s3 = inlined_call_operand.vmem [shape: bf16[3,128,128], index: 3, kind: input, shape index: {}]   ;;  %s4052_s4 = inlined_call_operand.vmem [shape: f32[3,128], index: 4, kind: input, shape index: {}]   ;;  %s4053_s5 = inlined_call_operand.hbm [shape: f32[4,128,128], index: 5, kind: output, shape index: {}]  }
   0x1   :  { %12 = vsyncpa [#allocation3 + $0x1], 0 }
   0x2   :  { %13 = vsyncpa [#allocation6], 0 }
   0x3   :  { %15 = vsyncpa [#allocation6 + $0x1], 0 }
   0x4   :  { %16 = vsyncpa [#allocation4], 0 }
   0x5   :  { %18 = vsyncpa [#allocation4 + $0x1], 0  ;;  %s2980_s18 = smov 0   ;;  %s2982_s19 = smov 0  }
   0x6   :  { %s2984_s20 = smov 0   ;;  %s2986_s21 = smov 0  }
   0x7 LB: > { %s3001_s22 = sadd.s32 4294967295, %s2941_s21   ;;  %s2112_s23 = sadd.s32 4294967294, %s2941_s21   ;;  %s2941_s21 = sphi %s2986_s21, %s4071_s21   ;;  %s2937_s20 = sphi %s2984_s20, %s4070_s20   ;;  %s2933_s19 = sphi %s2982_s19, %s4069_s19   ;;  %s2929_s18 = sphi %s2980_s18, %s4068_s18  }
   0x8   : > { %s3005_s24 = sadd.s32 1, %s2941_s21   ;;  %s57_s25 = sadd.s32 1, %s2937_s20 }
   0x9   : > { %s54_s26 = ssub.s32 %s2941_s21, %s3005_s24  ;;  %p64_p0 = scmp.ne.s32.totalorder %s2937_s20, %s2933_s19 }
   0xa   : > { %p55_p1 = scmp.eq.s32.totalorder %s54_s26, 0  ;;  %p65_p2 = scmp.eq.s32.totalorder %s2941_s21, 0 }
   0xb   : > { %p70_p3 = scmp.ne.s32.totalorder %s2933_s19, %s2929_s18  ;;  %p71_p4 = scmp.eq.s32.totalorder %s3001_s22, 0 }
   0xc   : > { %s3017_s27 = scalar_select %p55_p1, %s2937_s20, %s57_s25  }
   0xd   : > { %p3019_p5 = por %p65_p2, %p64_p0  ;;  %p3023_p6 = por %p71_p4, %p70_p3 }
   0xe   : > { %p162_p7 = scmp.eq.s32.totalorder %s3001_s22, 1  ;;  %p168_p8 = scmp.eq.s32.totalorder %s2112_s23, 1 }
   0xf   : > { %s4058_s29 = scalar_select %p3023_p6, 1, 0 }
  0x10   : > { %p2627_p10 = scmp.lt.s32.totalorder %s2941_s21, 2  ;;  %p3030_p11 = por %p162_p7, %p64_p0 }
  0x11   : > { %p3034_p12 = por %p168_p8, %p70_p3  ;;  %s3039_s7 = sand.u32 1, %s2937_s20  }
  0x12   : > { %s4059_s30 = scalar_select %p3030_p11, 1, 0 }
  0x13   : > { %s4060_s6 = scalar_select %p3034_p12, 1, 0 }
  0x14   : > { %s2196_s8 = sshll.u32 %s2941_s21, 12  ;;  %s2115_s9 = sshll.u32 %s3039_s7, 8 }
  0x15   : > { %s3048_s12 = scalar_lea.hbm %s4049_s1, %s2196_s8  ;;  %s208_s13 = scalar_lea.vmem [#allocation2], %s2115_s9 }
  0x16   : > { %s216_s14 = sshll.u32 %s208_s13, 4  ;;  %p3054_p13 = pnand %p2627_p10, %p3019_p5  ;;  %s3058_s14 = int_to_ptr.vmem [resolvable:$true] %s216_s14 }
  0x17   : > { %s205_s16 = scalar_lea.sflag [#allocation3], %s3039_s7  ;;  %s2817_s17 = scalar_lea.hbm %s3048_s12, 4096 }
  0x18   : > { %p2818_p0 = scmp.ne.s32.totalorder %s3048_s12, %s2817_s17  ;;  %p2819_p1 = pneg %p3054_p13 }
  0x19   : > { %s2822_s26 = scalar_lea.hbm %s4049_s1, 8192  ;;  %p2823_p4 = scmp.lt.s32.totalorder %s3048_s12, %s4049_s1 }
  0x1a   : > { %p2820_p2 = pnand %p2819_p1, %p2818_p0  ;;  %p2824_p5 = scmp.lt.s32.totalorder %s2822_s26, %s2817_s17 }
  0x1c   : > { %p2821_p3 = pneg %p2820_p2  ;;  %p2825_p7 = por %p2824_p5, %p2823_p4 }
  0x1e   : > { %p2826_p8 = pnand %p2825_p7, %p2821_p3 }
  0x20   : > { %2829 = shalt.err (!%p2826_p8)
}
  0x21   : > { %s2830_s11 = scalar_lea.vmem %s3058_s14, 4096  ;;  %s2943_s13 = smov [#allocation2]  }
  0x22   : > { %p2831_p10 = scmp.ne.s32.totalorder %s3058_s14, %s2830_s11  ;;  %s2835_s23 = sshll.u32 %s2943_s13, 4  ;;  %s2836_s23 = int_to_ptr.vmem [resolvable:$false] %s2835_s23 }
  0x23   : > { %s2837_s25 = scalar_lea.vmem %s2836_s23, 8192  ;;  %p2838_p9 = scmp.lt.s32.totalorder %s3058_s14, %s2836_s23 }
  0x24   : > { %p2833_p0 = pnand %p2831_p10, %p2819_p1  ;;  %p2839_p12 = scmp.lt.s32.totalorder %s2837_s25, %s2830_s11 }
  0x26   : > { %p2834_p2 = pneg %p2833_p0  ;;  %p2840_p11 = por %p2839_p12, %p2838_p9 }
  0x28   : > { %p2841_p4 = pnand %p2840_p11, %p2834_p2 }
  0x2a   : > { %2844 = shalt.err (!%p2841_p4)
}
  0x2b   : > { %s4055_s17 = smov 128   ;;  %s2945_s26 = smov 8  }
  0x2c   : > { %2619 = dma.hbm_to_vmem [thread:$0]  (!%p3054_p13), %s3048_s12, 4096, %s3058_s14, %s205_s16, %s4055_s17, %s4055_s17, %s2945_s26  }
  0x2d   : > { %p2123_p9 = scmp.ge.s32.totalorder %s2941_s21, 1  ;;  %p246_p11 = scmp.lt.s32.totalorder %s2941_s21, 3 }
  0x2e   : > { %s3101_s13 = scalar_lea.hbm %s4050_s2, %s2196_s8  ;;  %s230_s23 = scalar_lea.vmem [#allocation5], %s2115_s9 }
  0x2f   : > { %p3092_p12 = pnand %p2123_p9, %p246_p11  ;;  %s238_s25 = sshll.u32 %s230_s23, 4  ;;  %s3105_s25 = int_to_ptr.vmem [resolvable:$true] %s238_s25 }
  0x30   : > { %s227_s12 = scalar_lea.sflag [#allocation6], %s3039_s7  ;;  %s2845_s14 = scalar_lea.hbm %s3101_s13, 4096 }
  0x31   : > { %p2846_p3 = scmp.ne.s32.totalorder %s3101_s13, %s2845_s14  ;;  %s2850_s8 = scalar_lea.hbm %s4050_s2, 8192 }
  0x32   : > { %p2851_p8 = scmp.lt.s32.totalorder %s3101_s13, %s4050_s2  ;;  %p2852_p10 = scmp.lt.s32.totalorder %s2850_s8, %s2845_s14 }
  0x33   : > { %p2848_p5 = pnand %p2846_p3, %p2819_p1 }
  0x34   : > { %p2853_p0 = por %p2852_p10, %p2851_p8 }
  0x35   : > { %p2849_p7 = pneg %p2848_p5 }
  0x37   : > { %p2854_p2 = pnand %p2853_p0, %p2849_p7 }
  0x39   : > { %2857 = shalt.err (!%p2854_p2)
}
  0x3a   : > { %s2858_s7 = scalar_lea.vmem %s3105_s25, 4096  ;;  %s2946_s9 = smov [#allocation5]  }
  0x3b   : > { %p2859_p4 = scmp.ne.s32.totalorder %s3105_s25, %s2858_s7  ;;  %s2863_s17 = sshll.u32 %s2946_s9, 4  ;;  %s2864_s17 = int_to_ptr.vmem [resolvable:$false] %s2863_s17 }
  0x3c   : > { %s2865_s23 = scalar_lea.vmem %s2864_s17, 8192  ;;  %p2866_p3 = scmp.lt.s32.totalorder %s3105_s25, %s2864_s17 }
  0x3d   : > { %p2861_p9 = pnand %p2859_p4, %p2819_p1  ;;  %p2867_p5 = scmp.lt.s32.totalorder %s2865_s23, %s2858_s7 }
  0x3f   : > { %p2862_p11 = pneg %p2861_p9  ;;  %p2868_p6 = por %p2867_p5, %p2866_p3 }
  0x41   : > { %p2869_p8 = pnand %p2868_p6, %p2862_p11 }
  0x43   : > { %2872 = shalt.err (!%p2869_p8)
}
  0x44   : > { %s4063_s14 = smov 128   ;;  %250 = sbr.rel (%p3092_p12) target bundleno = 1031 (0x407), region = 40 }
  0x45   : > { %2622 = dma.hbm_to_vmem [thread:$0]  (!%p3054_p13), %s3101_s13, 4096, %s3105_s25, %s227_s12, %s4063_s14, %s4063_s14, %s2945_s26  }
  0x46   : > { %s3136_s16 = sand.u32 (!%p3092_p12), 1, %s2933_s19   ;;  %p4064_p6 = scmp.ne.s32.totalorder (!%p3092_p12), %s4058_s29, 0 }
  0x47   : > { %s3139_s8 = sshll.u32 (!%p3092_p12), %s3136_s16, 8  ;;  %s253_s10 = scalar_lea.sflag (!%p3092_p12), [#allocation3], %s3136_s16 }
  0x48   : > { %s3143_s15 = scalar_lea.vmem (!%p3092_p12), [#allocation2], %s3139_s8 }
  0x49   : > { %2916 = dma.done.wait (%p4064_p6), %s253_s10, 4096  }
  0x4a   : > { %2918 = vsyncadd (%p4064_p6), %s253_s10, 4294963200  ;;  %s262_s26 = scalar_lea.sflag [#allocation6], %s3136_s16  ;;  %s3151_s28 = scalar_lea.vmem [#allocation5], %s3139_s8 }
  0x4b   : > { %2920 = dma.done.wait (%p4064_p6), %s262_s26, 4096  }
  0x4c   : > { %2922 = vsyncadd (%p4064_p6), %s262_s26, 4294963200  ;;  %v2665_v0 = vld [vmem:[%s4051_s3 + $0x78] sm:$0xff]   ;;  %v2666_v1 = vld [vmem:[%s4051_s3 + $0x70] sm:$0xff]   ;;  %s2127_s23 = sshll.u32 %s3001_s22, 1  ;;  %s3964_s26 = scalar_lea.vmem [#allocation7], %s3139_s8 }
  0x4d   : > { %2386 = vmatprep.subr.bf16.mxu1 %v2665_v0  ;;  %v2667_v2 = vld [vmem:[%s4051_s3 + $0x68] sm:$0xff]   ;;  %v2668_v3 = vld [vmem:[%s4051_s3 + $0x60] sm:$0xff]   ;;  %v2669_v7 = vld [vmem:[%s4051_s3 + $0x58] sm:$0xff]   ;;  %p304_p13 = scmp.lt.s32.totalorder %s2127_s23, 3  ;;  %s2201_s8 = sshll.u32 %s3001_s22, 12 }
  0x4e   : > { %2387 = vmatpush3.bf16.msra.mxu1 %v2665_v0  ;;  %v362_v4 = vld [vmem:[%s3143_s15] sm:$0xff]  ;;  %v363_v5 = vld [vmem:[%s3143_s15 + $0x8] sm:$0xff]  ;;  %v2670_v8 = vld [vmem:[%s4051_s3 + $0x50] sm:$0xff]   ;;  %s2004_s13 = sshll.u32 %s3964_s26, 4  ;;  %s1990_s22 = scalar_lea.sflag [#allocation4], %s3136_s16  ;;  %s4003_s13 = int_to_ptr.vmem [resolvable:$true] %s2004_s13 }
  0x4f   : > { %2388 = vmatprep.subr.bf16.mxu1 %v2666_v1  ;;  %v394_v6 = vpack.c.bf16 %v363_v5, %v362_v4  ;;  %s4073_s23 = smov (!%p304_p13, %s2127_s23), 3  ;;  %v2673_v9 = vld [vmem:[%s4051_s3 + $0x38] sm:$0xff]   ;;  %v2674_v10 = vld [vmem:[%s4051_s3 + $0x30] sm:$0xff]   ;;  %v2671_v11 = vld [vmem:[%s4051_s3 + $0x48] sm:$0xff]   ;;  %p4065_p12 = scmp.ne.s32.totalorder %s4059_s30, 0 }
  0x50   : > { %2338 = vmatprep.subr.bf16.mxu0 %v2673_v9  ;;  %s2199_s17 = sshll.u32 %s4073_s23, 7  ;;  %v2675_v12 = vld [vmem:[%s4051_s3 + $0x28] sm:$0xff]   ;;  %v2672_v13 = vld [vmem:[%s4051_s3 + $0x40] sm:$0xff]   ;;  %v364_v16 = vld [vmem:[%s3143_s15 + $0x10] sm:$0xff]  ;;  %s2873_s23 = scalar_lea.vmem %s4003_s13, 4096 }
  0x51   : > { %2402 = vmatprep.mubr.bf16.mxu1 %v394_v6  ;;  %2339 = vmatpush3.bf16.msra.mxu0 %v2673_v9  ;;  %s3193_s25 = scalar_lea.vmem %s4048_s0, %s2199_s17  ;;  %v2676_v14 = vld [vmem:[%s4051_s3 + $0x20] sm:$0xff]   ;;  %v365_v17 = vld [vmem:[%s3143_s15 + $0x18] sm:$0xff]  ;;  %v367_v20 = vld [vmem:[%s3143_s15 + $0x28] sm:$0xff]  ;;  %p2874_p1 = scmp.ne.s32.totalorder %s4003_s13, %s2873_s23 }
  0x52   : > { %2389 = vmatpush3.bf16.msra.mxu1 %v2666_v1  ;;  %2340 = vmatprep.subr.bf16.mxu0 %v2674_v10  ;;  %v314_v15 = vld [vmem:[%s3193_s25] sm:$0xff]  ;;  %v315_v18 = vld [vmem:[%s3193_s25 + $0x8] sm:$0xff]  ;;  %v2677_v22 = vld [vmem:[%s4051_s3 + $0x18] sm:$0xff]   ;;  %v395_v23 = vpack.c.bf16 %v365_v17, %v364_v16  ;;  %s2947_s7 = smov [#allocation7]  }
  0x53   : > { %2390 = vmatprep.subr.bf16.mxu1 %v2667_v2  ;;  %v366_v19 = vld [vmem:[%s3143_s15 + $0x20] sm:$0xff]  ;;  %v346_v21 = vpack.c.bf16 %v315_v18, %v314_v15  ;;  %v2678_v25 = vld [vmem:[%s4051_s3 + $0x10] sm:$0xff]   ;;  %v369_v27 = vld [vmem:[%s3143_s15 + $0x38] sm:$0xff]  ;;  %p2875_p7 = pnand %p2874_p1, %p4065_p12  ;;  %s2877_s9 = sshll.u32 %s2947_s7, 4  ;;  %s2878_s9 = int_to_ptr.vmem [resolvable:$false] %s2877_s9 }
  0x54   : > { %v396_v24 = vpack.c.bf16 %v367_v20, %v366_v19  ;;  %v368_v26 = vld [vmem:[%s3143_s15 + $0x30] sm:$0xff]  ;;  %v370_v28 = vld [vmem:[%s3143_s15 + $0x40] sm:$0xff]  ;;  %v371_v29 = vld [vmem:[%s3143_s15 + $0x48] sm:$0xff]  ;;  %p2880_p0 = scmp.lt.s32.totalorder %s4003_s13, %s2878_s9 }
  0x55   : > { %2341 = vmatpush3.bf16.msra.mxu0 %v2674_v10  ;;  %2354 = vmatprep.mubr.bf16.mxu0 %v346_v21  ;;  %v2679_v30 = vld [vmem:[%s4051_s3 + $0x8] sm:$0xff]   ;;  %v397_v31 = vpack.c.bf16 %v369_v27, %v368_v26  ;;  %v398_v32 = vpack.c.bf16 %v371_v29, %v370_v28  ;;  %v372_v33 = vld [vmem:[%s3143_s15 + $0x50] sm:$0xff]  ;;  %v373_v34 = vld [vmem:[%s3143_s15 + $0x58] sm:$0xff]  ;;  %p2876_p10 = pneg %p2875_p7 }
  0x56   : > { %2391 = vmatpush3.bf16.msra.mxu1 %v2667_v2  ;;  %2342 = vmatprep.subr.bf16.mxu0 %v2675_v12  ;;  %v2680_v35 = vld [vmem:[%s4051_s3] sm:$0xff]   ;;  %v375_v37 = vld [vmem:[%s3143_s15 + $0x68] sm:$0xff]  ;;  %v316_v38 = vld [vmem:[%s3193_s25 + $0x10] sm:$0xff]  ;;  %v399_v43 = vpack.c.bf16 %v373_v34, %v372_v33 }
  0x57   : > { %2392 = vmatprep.subr.bf16.mxu1 %v2668_v3  ;;  %v374_v36 = vld [vmem:[%s3143_s15 + $0x60] sm:$0xff]  ;;  %v317_v39 = vld [vmem:[%s3193_s25 + $0x18] sm:$0xff]  ;;  %v319_v41 = vld [vmem:[%s3193_s25 + $0x28] sm:$0xff] }
  0x58   : > { %v318_v40 = vld [vmem:[%s3193_s25 + $0x20] sm:$0xff]  ;;  %v2681_v42 = vld [vmem:[%s4051_s3 + $0xb8] sm:$0xff]   ;;  %v400_v44 = vpack.c.bf16 %v375_v37, %v374_v36  ;;  %v347_v45 = vpack.c.bf16 %v317_v39, %v316_v38  ;;  %v2682_v47 = vld [vmem:[%s4051_s3 + $0xb0] sm:$0xff]  }
  0x59   : > { %2343 = vmatpush3.bf16.msra.mxu0 %v2675_v12  ;;  %v348_v46 = vpack.c.bf16 %v319_v41, %v318_v40  ;;  %v376_v48 = vld [vmem:[%s3143_s15 + $0x70] sm:$0xff]  ;;  %v377_v49 = vld [vmem:[%s3143_s15 + $0x78] sm:$0xff]  ;;  %v378_v50 = vld [vmem:[%s3143_s15 + $0x80] sm:$0xff] }
  0x5a   : > { %2393 = vmatpush3.bf16.msra.mxu1 %v2668_v3  ;;  %2344 = vmatprep.subr.bf16.mxu0 %v2676_v14  ;;  %v379_v51 = vld [vmem:[%s3143_s15 + $0x88] sm:$0xff]  ;;  %v320_v52 = vld [vmem:[%s3193_s25 + $0x30] sm:$0xff]  ;;  %v321_v53 = vld [vmem:[%s3193_s25 + $0x38] sm:$0xff]  ;;  %v401_v57 = vpack.c.bf16 %v377_v49, %v376_v48 }
  0x5b   : > { %2394 = vmatprep.subr.bf16.mxu1 %v2669_v7  ;;  %v322_v54 = vld [vmem:[%s3193_s25 + $0x40] sm:$0xff]  ;;  %v323_v55 = vld [vmem:[%s3193_s25 + $0x48] sm:$0xff]  ;;  %v402_v58 = vpack.c.bf16 %v379_v51, %v378_v50  ;;  %v349_v59 = vpack.c.bf16 %v321_v53, %v320_v52  ;;  %v380_v62 = vld [vmem:[%s3143_s15 + $0x90] sm:$0xff] }
  0x5c   : > { %v2683_v56 = vld [vmem:[%s4051_s3 + $0xa8] sm:$0xff]   ;;  %v350_v60 = vpack.c.bf16 %v323_v55, %v322_v54  ;;  %v2684_v61 = vld [vmem:[%s4051_s3 + $0xa0] sm:$0xff]   ;;  %v381_v63 = vld [vmem:[%s3143_s15 + $0x98] sm:$0xff] }
  0x5d   : > { %2345 = vmatpush3.bf16.msra.mxu0 %v2676_v14  ;;  %v382_v0 = vld [vmem:[%s3143_s15 + $0xa0] sm:$0xff]  ;;  %v383_v1 = vld [vmem:[%s3143_s15 + $0xa8] sm:$0xff]  ;;  %v324_v2 = vld [vmem:[%s3193_s25 + $0x50] sm:$0xff] }
  0x5e   : > { %2395 = vmatpush3.bf16.msra.mxu1 %v2669_v7  ;;  %2346 = vmatprep.subr.bf16.mxu0 %v2677_v22  ;;  %v325_v3 = vld [vmem:[%s3193_s25 + $0x58] sm:$0xff]  ;;  %v326_v4 = vld [vmem:[%s3193_s25 + $0x60] sm:$0xff]  ;;  %v327_v5 = vld [vmem:[%s3193_s25 + $0x68] sm:$0xff]  ;;  %v403_v7 = vpack.c.bf16 %v381_v63, %v380_v62 }
  0x5f   : > { %2396 = vmatprep.subr.bf16.mxu1 %v2670_v8  ;;  %v2685_v6 = vld [vmem:[%s4051_s3 + $0x98] sm:$0xff]   ;;  %v351_v9 = vpack.c.bf16 %v325_v3, %v324_v2  ;;  %v352_v10 = vpack.c.bf16 %v327_v5, %v326_v4  ;;  %v384_v12 = vld [vmem:[%s3143_s15 + $0xb0] sm:$0xff]  ;;  %v386_v14 = vld [vmem:[%s3143_s15 + $0xc0] sm:$0xff] }
  0x60   : > { %v387_v15 = vld [vmem:[%s3143_s15 + $0xc8] sm:$0xff]  ;;  %v328_v16 = vld [vmem:[%s3193_s25 + $0x70] sm:$0xff]  ;;  %v329_v17 = vld [vmem:[%s3193_s25 + $0x78] sm:$0xff] }
  0x61   : > { %2347 = vmatpush3.bf16.msra.mxu0 %v2677_v22  ;;  %v330_v18 = vld [vmem:[%s3193_s25 + $0x80] sm:$0xff]  ;;  %v331_v19 = vld [vmem:[%s3193_s25 + $0x88] sm:$0xff]  ;;  %v406_v21 = vpack.c.bf16 %v387_v15, %v386_v14  ;;  %v353_v22 = vpack.c.bf16 %v329_v17, %v328_v16  ;;  %v332_v28 = vld [vmem:[%s3193_s25 + $0x90] sm:$0xff] }
  0x62   : > { %2397 = vmatpush3.bf16.msra.mxu1 %v2670_v8  ;;  %2348 = vmatprep.subr.bf16.mxu0 %v2678_v25  ;;  %v404_v8 = vpack.c.bf16 %v383_v1, %v382_v0  ;;  %v390_v26 = vld [vmem:[%s3143_s15 + $0xe0] sm:$0xff]  ;;  %v391_v27 = vld [vmem:[%s3143_s15 + $0xe8] sm:$0xff]  ;;  %v333_v29 = vld [vmem:[%s3193_s25 + $0x98] sm:$0xff] }
  0x63   : > { %2398 = vmatprep.subr.bf16.mxu1 %v2671_v11  ;;  %v408_v33 = vpack.c.bf16 %v391_v27, %v390_v26  ;;  %v355_v34 = vpack.c.bf16 %v333_v29, %v332_v28  ;;  %v392_v36 = vld [vmem:[%s3143_s15 + $0xf0] sm:$0xff]  ;;  %v393_v37 = vld [vmem:[%s3143_s15 + $0xf8] sm:$0xff]  ;;  %v338_v40 = vld [vmem:[%s3193_s25 + $0xc0] sm:$0xff] }
  0x64   : > { %v336_v38 = vld [vmem:[%s3193_s25 + $0xb0] sm:$0xff]  ;;  %v337_v39 = vld [vmem:[%s3193_s25 + $0xb8] sm:$0xff]  ;;  %v339_v41 = vld [vmem:[%s3193_s25 + $0xc8] sm:$0xff] }
  0x65   : > { %2349 = vmatpush3.bf16.msra.mxu0 %v2678_v25  ;;  %v389_v25 = vld [vmem:[%s3143_s15 + $0xd8] sm:$0xff]  ;;  %v343_v48 = vld [vmem:[%s3193_s25 + $0xe8] sm:$0xff]  ;;  %v344_v52 = vld [vmem:[%s3193_s25 + $0xf0] sm:$0xff] }
  0x66   : > { %2399 = vmatpush3.bf16.msra.mxu1 %v2671_v11  ;;  %2350 = vmatprep.subr.bf16.mxu0 %v2679_v30  ;;  %v2686_v11 = vld [vmem:[%s4051_s3 + $0x90] sm:$0xff]   ;;  %v2687_v51 = vld [vmem:[%s4051_s3 + $0x88] sm:$0xff]   ;;  %v345_v53 = vld [vmem:[%s3193_s25 + $0xf8] sm:$0xff] }
  0x67   : > { %2400 = vmatprep.subr.bf16.mxu1 %v2672_v13  ;;  %v2688_v54 = vld [vmem:[%s4051_s3 + $0x80] sm:$0xff]   ;;  %v415_v62 = vld [vmem:[%s3151_s28 + $0x28] sm:$0xff]  ;;  %v416_v1 = vld [vmem:[%s3151_s28 + $0x30] sm:$0xff] }
  0x68   : > { %v410_v55 = vld [vmem:[%s3151_s28] sm:$0xff]  ;;  %v417_v2 = vld [vmem:[%s3151_s28 + $0x38] sm:$0xff]  ;;  %v419_v4 = vld [vmem:[%s3151_s28 + $0x48] sm:$0xff] }
  0x69   : > { %2351 = vmatpush3.bf16.msra.mxu0 %v2679_v30  ;;  %v334_v30 = vld [vmem:[%s3193_s25 + $0xa0] sm:$0xff]  ;;  %v445_v5 = vpack.c.bf16 %v417_v2, %v416_v1  ;;  %v425_v14 = vld [vmem:[%s3151_s28 + $0x78] sm:$0xff]  ;;  %v427_v17 = vld [vmem:[%s3151_s28 + $0x88] sm:$0xff] }
  0x6a   : > { %2401 = vmatpush3.bf16.msra.mxu1 %v2672_v13  ;;  %2352 = vmatprep.subr.bf16.mxu0 %v2680_v35  ;;  %v385_v13 = vld [vmem:[%s3143_s15 + $0xb8] sm:$0xff]  ;;  %v418_v3 = vld [vmem:[%s3151_s28 + $0x40] sm:$0xff]  ;;  %v435_v29 = vld [vmem:[%s3151_s28 + $0xc8] sm:$0xff] }
  0x6b   : > { %v405_v20 = vpack.c.bf16 %v385_v13, %v384_v12  ;;  %v424_v13 = vld [vmem:[%s3151_s28 + $0x70] sm:$0xff]  ;;  %v426_v16 = vld [vmem:[%s3151_s28 + $0x80] sm:$0xff]  ;;  %v433_v26 = vld [vmem:[%s3151_s28 + $0xb8] sm:$0xff] }
  0x6c   : > { %v449_v15 = vpack.c.bf16 %v425_v14, %v424_v13  ;;  %v434_v28 = vld [vmem:[%s3151_s28 + $0xc0] sm:$0xff] }
  0x6d   : > { %2403 = vmatmul.mubr.bf16.vlgmr.msra.gmra.mxu1 %v395_v23  ;;  %2353 = vmatpush3.bf16.msra.mxu0 %v2680_v35  ;;  %v354_v23 = vpack.c.bf16 %v331_v19, %v330_v18  ;;  %v450_v18 = vpack.c.bf16 %v427_v17, %v426_v16  ;;  %v428_v19 = vld [vmem:[%s3151_s28 + $0x90] sm:$0xff] }
  0x6e   : > { %2406 = vmatprep.mubr.bf16.mxu1 %v396_v24  ;;  %2434 = vmatprep.subr.bf16.mxu0 %v2681_v42  ;;  %v388_v24 = vld [vmem:[%s3143_s15 + $0xd0] sm:$0xff]  ;;  %s4001_s15 = scalar_lea.hbm %s4053_s5, %s2201_s8 }
  0x70   : > { %2355 = vmatmul.mubr.bf16.vlgmr.msra.gmra.mxu0 %v347_v45  ;;  %v340_v45 = vld [vmem:[%s3193_s25 + $0xd0] sm:$0xff] }
  0x71   : > { %2358 = vmatprep.mubr.bf16.mxu0 %v348_v46  ;;  %2435 = vmatpush3.bf16.msra.mxu0 %v2681_v42  ;;  %v409_v42 = vpack.c.bf16 %v393_v37, %v392_v36  ;;  %v341_v46 = vld [vmem:[%s3193_s25 + $0xd8] sm:$0xff]  ;;  %v440_v37 = vld [vmem:[%s3151_s28 + $0xf0] sm:$0xff] }
  0x72   : > { %2436 = vmatprep.subr.bf16.mxu0 %v2682_v47  ;;  %v359_v49 = vpack.c.bf16 %v341_v46, %v340_v45 }
  0x75   : > { %2407 = vmatmul.mubr.bf16.gmra.mxu1 %v397_v31  ;;  %2437 = vmatpush3.bf16.msra.mxu0 %v2682_v47  ;;  %v335_v31 = vld [vmem:[%s3193_s25 + $0xa8] sm:$0xff]  ;;  %v342_v47 = vld [vmem:[%s3193_s25 + $0xe0] sm:$0xff]  ;;  %s2879_s25 = scalar_lea.vmem %s2878_s9, 8192 }
  0x76   : > { %2410 = vmatprep.mubr.bf16.mxu1 %v398_v32  ;;  %2438 = vmatprep.subr.bf16.mxu0 %v2683_v56  ;;  %v407_v32 = vpack.c.bf16 %v389_v25, %v388_v24  ;;  %v356_v35 = vpack.c.bf16 %v335_v31, %v334_v30  ;;  %v360_v50 = vpack.c.bf16 %v343_v48, %v342_v47  ;;  %v432_v25 = vld [vmem:[%s3151_s28 + $0xb0] sm:$0xff]  ;;  %p2881_p2 = scmp.lt.s32.totalorder %s2879_s25, %s2873_s23 }
  0x77   : > { %v453_v27 = vpack.c.bf16 %v433_v26, %v432_v25  ;;  %v454_v30 = vpack.c.bf16 %v435_v29, %v434_v28  ;;  %v436_v31 = vld [vmem:[%s3151_s28 + $0xd0] sm:$0xff] }
  0x78   : > { %2359 = vmatmul.mubr.bf16.gmra.mxu0 %v349_v59  ;;  %v412_v59 = vld [vmem:[%s3151_s28 + $0x10] sm:$0xff]  ;;  %p2882_p4 = por %p2881_p2, %p2880_p0 }
  0x79   : > { %2362 = vmatprep.mubr.bf16.mxu0 %v350_v60  ;;  %2439 = vmatpush3.bf16.msra.mxu0 %v2683_v56  ;;  %v411_v56 = vld [vmem:[%s3151_s28 + $0x8] sm:$0xff]  ;;  %v413_v60 = vld [vmem:[%s3151_s28 + $0x18] sm:$0xff] }
  0x7a   : > { %2440 = vmatprep.subr.bf16.mxu0 %v2684_v61  ;;  %v443_v63 = vpack.c.bf16 %v413_v60, %v412_v59  ;;  %p2883_p9 = pnand %p2882_p4, %p2876_p10 }
  0x7d   : > { %2411 = vmatmul.mubr.bf16.gmra.mxu1 %v399_v43  ;;  %2441 = vmatpush3.bf16.msra.mxu0 %v2684_v61  ;;  %v357_v43 = vpack.c.bf16 %v337_v39, %v336_v38  ;;  %v414_v61 = vld [vmem:[%s3151_s28 + $0x20] sm:$0xff]  ;;  %v441_v38 = vld [vmem:[%s3151_s28 + $0xf8] sm:$0xff] }
  0x7e   : > { %2414 = vmatprep.mubr.bf16.mxu1 %v400_v44  ;;  %2442 = vmatprep.subr.bf16.mxu0 %v2685_v6  ;;  %v358_v44 = vpack.c.bf16 %v339_v41, %v338_v40  ;;  %v444_v0 = vpack.c.bf16 %v415_v62, %v414_v61  ;;  %v457_v39 = vpack.c.bf16 %v441_v38, %v440_v37  ;;  %v3334_v41 = vld [vmem:[%s4052_s4 + $0x1] ss:$0 sm:$0xff] }
  0x80   : > { %2363 = vmatmul.mubr.bf16.gmra.mxu0 %v351_v9  ;;  %v422_v9 = vld [vmem:[%s3151_s28 + $0x60] sm:$0xff] }
  0x81   : > { %2366 = vmatprep.mubr.bf16.mxu0 %v352_v10  ;;  %2443 = vmatpush3.bf16.msra.mxu0 %v2685_v6  ;;  %v446_v6 = vpack.c.bf16 %v419_v4, %v418_v3  ;;  %v423_v10 = vld [vmem:[%s3151_s28 + $0x68] sm:$0xff] }
  0x82   : > { %2444 = vmatprep.subr.bf16.mxu0 %v2686_v11  ;;  %v448_v12 = vpack.c.bf16 %v423_v10, %v422_v9 }
  0x85   : > { %2415 = vmatmul.mubr.bf16.gmra.mxu1 %v401_v57  ;;  %2445 = vmatpush3.bf16.msra.mxu0 %v2686_v11  ;;  %v361_v57 = vpack.c.bf16 %v345_v53, %v344_v52 }
  0x86   : > { %2418 = vmatprep.mubr.bf16.mxu1 %v402_v58  ;;  %2446 = vmatprep.subr.bf16.mxu0 %v2687_v51  ;;  %v442_v58 = vpack.c.bf16 %v411_v56, %v410_v55  ;;  %v3355_v55 = vld [vmem:[%s4052_s4] ss:$0 sm:$0xff] }
  0x88   : > { %2367 = vmatmul.mubr.bf16.gmra.mxu0 %v353_v22  ;;  %v430_v22 = vld [vmem:[%s3151_s28 + $0xa0] sm:$0xff] }
  0x89   : > { %2370 = vmatprep.mubr.bf16.mxu0 %v354_v23  ;;  %2447 = vmatpush3.bf16.msra.mxu0 %v2687_v51  ;;  %v431_v23 = vld [vmem:[%s3151_s28 + $0xa8] sm:$0xff] }
  0x8a   : > { %2448 = vmatprep.subr.bf16.mxu0 %v2688_v54  ;;  %v452_v24 = vpack.c.bf16 %v431_v23, %v430_v22 }
  0x8d   : > { %2419 = vmatmul.mubr.bf16.gmra.mxu1 %v403_v7  ;;  %2449 = vmatpush3.bf16.msra.mxu0 %v2688_v54  ;;  %v420_v7 = vld [vmem:[%s3151_s28 + $0x50] sm:$0xff] }
  0x8e   : > { %2422 = vmatprep.mubr.bf16.mxu1 %v404_v8  ;;  %v421_v8 = vld [vmem:[%s3151_s28 + $0x58] sm:$0xff] }
  0x8f   : > { %v447_v11 = vpack.c.bf16 %v421_v8, %v420_v7 }
  0x90   : > { %2371 = vmatmul.mubr.bf16.gmra.mxu0 %v355_v34  ;;  %v438_v34 = vld [vmem:[%s3151_s28 + $0xe0] sm:$0xff] }
  0x91   : > { %2374 = vmatprep.mubr.bf16.mxu0 %v356_v35  ;;  %v439_v35 = vld [vmem:[%s3151_s28 + $0xe8] sm:$0xff] }
  0x92   : > { %v456_v36 = vpack.c.bf16 %v439_v35, %v438_v34 }
  0x95   : > { %2423 = vmatmul.mubr.bf16.gmra.mxu1 %v405_v20  ;;  %v429_v20 = vld [vmem:[%s3151_s28 + $0x98] sm:$0xff] }
  0x96   : > { %2426 = vmatprep.mubr.bf16.mxu1 %v406_v21  ;;  %v451_v21 = vpack.c.bf16 %v429_v20, %v428_v19 }
  0x98   : > { %2375 = vmatmul.mubr.bf16.gmra.mxu0 %v357_v43 }
  0x99   : > { %2378 = vmatprep.mubr.bf16.mxu0 %v358_v44 }
  0x9d   : > { %2427 = vmatmul.mubr.bf16.gmra.mxu1 %v407_v32  ;;  %v437_v32 = vld [vmem:[%s3151_s28 + $0xd8] sm:$0xff] }
  0x9e   : > { %2430 = vmatprep.mubr.bf16.mxu1 %v408_v33  ;;  %v455_v33 = vpack.c.bf16 %v437_v32, %v436_v31 }
  0xa0   : > { %2379 = vmatmul.mubr.bf16.gmra.mxu0 %v359_v49 }
  0xa1   : > { %2382 = vmatprep.mubr.bf16.mxu0 %v360_v50 }
  0xa5   : > { %2431 = vmatmul.mubr.bf16.gmra.mxu1 %v409_v42 }
  0xa8   : > { %2383 = vmatmul.mubr.bf16.gmra.mxu0 %v361_v57 }
  0xa9   : > { %2450 = vmatprep.mubr.bf16.mxu0 %v442_v58 }
  0xb0   : > { %2451 = vmatmul.mubr.bf16.vlgmr.msra.gmra.mxu0 %v443_v63 }
  0xb1   : > { %2454 = vmatprep.mubr.bf16.mxu0 %v444_v0 }
  0xb8   : > { %2455 = vmatmul.mubr.bf16.gmra.mxu0 %v445_v5 }
  0xb9   : > { %2458 = vmatprep.mubr.bf16.mxu0 %v446_v6 }
  0xc0   : > { %2459 = vmatmul.mubr.bf16.gmra.mxu0 %v447_v11 }
  0xc1   : > { %2462 = vmatprep.mubr.bf16.mxu0 %v448_v12 }
  0xc8   : > { %2463 = vmatmul.mubr.bf16.gmra.mxu0 %v449_v15 }
  0xc9   : > { %2466 = vmatprep.mubr.bf16.mxu0 %v450_v18 }
  0xd0   : > { %2467 = vmatmul.mubr.bf16.gmra.mxu0 %v451_v21 }
  0xd1   : > { %2470 = vmatprep.mubr.bf16.mxu0 %v452_v24 }
  0xd8   : > { %2471 = vmatmul.mubr.bf16.gmra.mxu0 %v453_v27 }
  0xd9   : > { %2474 = vmatprep.mubr.bf16.mxu0 %v454_v30 }
  0xe0   : > { %2475 = vmatmul.mubr.bf16.gmra.mxu0 %v455_v33 }
  0xe1   : > { %2478 = vmatprep.mubr.bf16.mxu0 %v456_v36 }
  0xe8   : > { %2479 = vmatmul.mubr.bf16.gmra.mxu0 %v457_v39 }
 0x12d   : > { %v2404_v40 = vpop.f32.mrf.mxu1 }
 0x12e   : > { %v801_v44 = vadd.f32 %v2404_v40, %v3334_v41 }
 0x12f   : > { %v792_v42 = vpop.f32.mrf.mxu1 }
 0x130   : > { %v793_v47 = vadd.f32 %v3334_v41, %v792_v42  ;;  %v2356_v57 = vpop.f32.mrf.mxu0 }
 0x131   : > { %v2405_v43 = vpop.f32.mrf.mxu1  ;;  %v3360_v59 = vadd.f32 %v2356_v57, %v3355_v55 }
 0x132   : > { %v804_v45 = vadd.f32 %v2405_v43, %v3334_v41  ;;  %v561_v60 = vpop.f32.mrf.mxu0 }
 0x133   : > { %v795_v46 = vpop.f32.mrf.mxu1  ;;  %v562_v0 = vadd.f32 %v3355_v55, %v561_v60 }
 0x134   : > { %v3339_v48 = vpack.c.bf16 %v804_v45, %v801_v44  ;;  %v796_v49 = vadd.f32 %v3334_v41, %v795_v46  ;;  %v2357_v62 = vpop.f32.mrf.mxu0 }
 0x135   : > { %v3342_v50 = vpop.f32.mrf.mxu1  ;;  %v3366_v1 = vadd.f32 %v2357_v62, %v3355_v55 }
 0x136   : > { %v3344_v51 = vpack.c.bf16 %v796_v49, %v793_v47  ;;  %v564_v2 = vpop.f32.mrf.mxu0 }
 0x137   : > { %v3346_v52 = vpop.f32.mrf.mxu1  ;;  %v1151_v4 = vpack.c.bf16 %v3366_v1, %v3360_v59  ;;  %v565_v5 = vadd.f32 %v3355_v55, %v564_v2 }
 0x138   : > { %v2360_v6 = vpop.f32.mrf.mxu0 }
 0x139   : > { %v3348_v53 = vpop.f32.mrf.mxu1  ;;  %v1150_v8 = vpack.c.bf16 %v565_v5, %v562_v0  ;;  %v3372_v9 = vadd.f32 %v2360_v6, %v3355_v55 }
 0x13a   : > { %v577_v10 = vpop.f32.mrf.mxu0 }
 0x13b   : > { %v3350_v54 = vpop.f32.mrf.mxu1  ;;  %v3375_v12 = vadd.f32 %v3355_v55, %v577_v10  ;;  %2498 = vmatprep.mubr.bf16.mxu1 %v1150_v8 }
 0x13c   : > { %v2361_v15 = vpop.f32.mrf.mxu0 }
 0x13d   : > { %v2412_v56 = vpop.f32.mrf.mxu1  ;;  %v3380_v17 = vadd.f32 %v2361_v15, %v3355_v55 }
 0x13e   : > { %v580_v21 = vpop.f32.mrf.mxu0  ;;  %v833_v40 = vadd.f32 %v2412_v56, %v3334_v41 }
 0x13f   : > { %v3357_v58 = vpop.f32.mrf.mxu1  ;;  %v1153_v23 = vpack.c.bf16 %v3380_v17, %v3372_v9  ;;  %v3387_v24 = vadd.f32 %v3355_v55, %v580_v21 }
 0x140   : > { %v2364_v27 = vpop.f32.mrf.mxu0  ;;  %v825_v10 = vadd.f32 %v3334_v41, %v3357_v58 }
 0x141   : > { %v2413_v61 = vpop.f32.mrf.mxu1  ;;  %v1152_v29 = vpack.c.bf16 %v3387_v24, %v3375_v12  ;;  %v3393_v30 = vadd.f32 %v2364_v27, %v3355_v55 }
 0x142   : > { %v593_v32 = vpop.f32.mrf.mxu0  ;;  %v836_v35 = vadd.f32 %v2413_v61, %v3334_v41 }
 0x143   : > { %v3362_v63 = vpop.f32.mrf.mxu1  ;;  %v3397_v34 = vadd.f32 %v3355_v55, %v593_v32 }
 0x144   : > { %v2365_v37 = vpop.f32.mrf.mxu0  ;;  %v1171_v49 = vpack.c.bf16 %v836_v35, %v833_v40  ;;  %v828_v5 = vadd.f32 %v3334_v41, %v3362_v63 }
 0x145   : > { %v2416_v3 = vpop.f32.mrf.mxu1  ;;  %v3402_v39 = vadd.f32 %v2365_v37, %v3355_v55 }
 0x146   : > { %v849_v13 = vadd.f32 %v2416_v3, %v3334_v41  ;;  %v596_v44 = vpop.f32.mrf.mxu0 }
 0x147   : > { %v840_v7 = vpop.f32.mrf.mxu1  ;;  %v1155_v46 = vpack.c.bf16 %v3402_v39, %v3393_v30  ;;  %v3413_v47 = vadd.f32 %v3355_v55, %v596_v44 }
 0x148   : > { %v841_v18 = vadd.f32 %v3334_v41, %v840_v7  ;;  %v2368_v60 = vpop.f32.mrf.mxu0 }
 0x149   : > { %v2417_v11 = vpop.f32.mrf.mxu1  ;;  %v1154_v56 = vpack.c.bf16 %v3413_v47, %v3397_v34  ;;  %v3422_v62 = vadd.f32 %v2368_v60, %v3355_v55  ;;  %v812_v60 = vadd.f32 %v3334_v41, %v3350_v54 }
 0x14a   : > { %v852_v14 = vadd.f32 %v2417_v11, %v3334_v41  ;;  %v609_v0 = vpop.f32.mrf.mxu0 }
 0x14b   : > { %v843_v16 = vpop.f32.mrf.mxu1  ;;  %v3427_v3 = vadd.f32 %v3355_v55, %v609_v0 }
 0x14c   : > { %v1173_v19 = vpack.c.bf16 %v852_v14, %v849_v13  ;;  %v844_v20 = vadd.f32 %v3334_v41, %v843_v16  ;;  %v2369_v6 = vpop.f32.mrf.mxu0  ;;  %v1170_v16 = vpack.c.bf16 %v828_v5, %v825_v10 }
 0x14d   : > { %v2420_v22 = vpop.f32.mrf.mxu1  ;;  %v3434_v8 = vadd.f32 %v2369_v6, %v3355_v55 }
 0x14e   : > { %v1172_v25 = vpack.c.bf16 %v844_v20, %v841_v18  ;;  %v865_v26 = vadd.f32 %v2420_v22, %v3334_v41  ;;  %2482 = vmatprep.subr.bf16.mxu1 %v1173_v19  ;;  %v612_v11 = vpop.f32.mrf.mxu0  ;;  %v820_v22 = vadd.f32 %v3348_v53, %v3334_v41 }
 0x14f   : > { %v856_v28 = vpop.f32.mrf.mxu1  ;;  %2483 = vmatpush3.bf16.xpose.msra.mxu1 %v1173_v19  ;;  %v1157_v14 = vpack.c.bf16 %v3434_v8, %v3422_v62  ;;  %v3441_v15 = vadd.f32 %v3355_v55, %v612_v11 }
 0x150   : > { %v857_v31 = vadd.f32 %v3334_v41, %v856_v28  ;;  %2484 = vmatprep.subr.bf16.mxu1 %v1172_v25  ;;  %v2372_v18 = vpop.f32.mrf.mxu0 }
 0x151   : > { %v2421_v33 = vpop.f32.mrf.mxu1  ;;  %v1156_v19 = vpack.c.bf16 %v3441_v15, %v3427_v3  ;;  %v3448_v20 = vadd.f32 %v2372_v18, %v3355_v55 }
 0x152   : > { %v868_v36 = vadd.f32 %v2421_v33, %v3334_v41  ;;  %v625_v58 = vpop.f32.mrf.mxu0 }
 0x153   : > { %v859_v38 = vpop.f32.mrf.mxu1  ;;  %v626_v27 = vadd.f32 %v3355_v55, %v625_v58 }
 0x154   : > { %v3405_v42 = vpack.c.bf16 %v868_v36, %v865_v26  ;;  %v860_v43 = vadd.f32 %v3334_v41, %v859_v38 }
 0x155   : > { %v3408_v45 = vpop.f32.mrf.mxu1 }
 0x156   : > { %v3415_v57 = vpack.c.bf16 %v860_v43, %v857_v31  ;;  %v817_v31 = vadd.f32 %v3342_v50, %v3334_v41 }
 0x157   : > { %v3417_v61 = vpop.f32.mrf.mxu1  ;;  %2485 = vmatpush3.bf16.xpose.msra.mxu1 %v1172_v25  ;;  %v2373_v25 = vpop.f32.mrf.mxu0 }
 0x158   : > { %2486 = vmatprep.subr.bf16.mxu1 %v1171_v49  ;;  %v3454_v28 = vadd.f32 %v2373_v25, %v3355_v55  ;;  %v1169_v37 = vpack.c.bf16 %v820_v22, %v817_v31 }
 0x159   : > { %v3424_v2 = vpop.f32.mrf.mxu1  ;;  %v628_v32 = vpop.f32.mrf.mxu0 }
 0x15a   : > { %v1159_v35 = vpack.c.bf16 %v3454_v28, %v3448_v20  ;;  %v629_v36 = vadd.f32 %v3355_v55, %v628_v32 }
 0x15b   : > { %v3431_v7 = vpop.f32.mrf.mxu1  ;;  %v2376_v38 = vpop.f32.mrf.mxu0 }
 0x15c   : > { %v1158_v40 = vpack.c.bf16 %v629_v36, %v626_v27  ;;  %v3462_v43 = vadd.f32 %v2376_v38, %v3355_v55 }
 0x15d   : > { %v2428_v13 = vpop.f32.mrf.mxu1  ;;  %v641_v44 = vpop.f32.mrf.mxu0 }
 0x15e   : > { %v3465_v50 = vadd.f32 %v3355_v55, %v641_v44  ;;  %2530 = vmatprep.mubr.bf16.mxu0 %v1158_v40 }
 0x15f   : > { %v3443_v63 = vpop.f32.mrf.mxu1  ;;  %2487 = vmatpush3.bf16.xpose.msra.mxu1 %v1171_v49  ;;  %v2377_v6 = vpop.f32.mrf.mxu0 }
 0x160   : > { %2488 = vmatprep.subr.bf16.mxu1 %v1170_v16  ;;  %v3472_v11 = vadd.f32 %v2377_v6, %v3355_v55 }
 0x161   : > { %v2429_v21 = vpop.f32.mrf.mxu1  ;;  %v644_v25 = vpop.f32.mrf.mxu0 }
 0x162   : > { %v1161_v54 = vpack.c.bf16 %v3472_v11, %v3462_v43  ;;  %v3481_v27 = vadd.f32 %v3355_v55, %v644_v25  ;;  %v900_v40 = vadd.f32 %v2429_v21, %v3334_v41 }
 0x163   : > { %v891_v26 = vpop.f32.mrf.mxu1 }
 0x165   : > { %v2432_v33 = vpop.f32.mrf.mxu1 }
 0x166   : > { %v913_v0 = vadd.f32 %v2432_v33, %v3334_v41  ;;  %v2380_v33 = vpop.f32.mrf.mxu0 }
 0x167   : > { %v904_v53 = vpop.f32.mrf.mxu1  ;;  %2489 = vmatpush3.bf16.xpose.msra.mxu1 %v1170_v16  ;;  %v809_v16 = vadd.f32 %v3334_v41, %v3346_v52  ;;  %v1160_v52 = vpack.c.bf16 %v3481_v27, %v3465_v50  ;;  %v3486_v36 = vadd.f32 %v2380_v33, %v3355_v55 }
 0x168   : > { %2490 = vmatprep.subr.bf16.mxu1 %v1169_v37  ;;  %v905_v18 = vadd.f32 %v3334_v41, %v904_v53  ;;  %v657_v38 = vpop.f32.mrf.mxu0 }
 0x169   : > { %v2433_v49 = vpop.f32.mrf.mxu1  ;;  %v1168_v31 = vpack.c.bf16 %v812_v60, %v809_v16  ;;  %v3489_v53 = vadd.f32 %v3355_v55, %v657_v38 }
 0x16a   : > { %v916_v5 = vadd.f32 %v2433_v49, %v3334_v41  ;;  %v2381_v44 = vpop.f32.mrf.mxu0 }
 0x16b   : > { %v907_v10 = vpop.f32.mrf.mxu1  ;;  %v3493_v49 = vadd.f32 %v2381_v44, %v3355_v55 }
 0x16c   : > { %v1181_v58 = vpack.c.bf16 %v916_v5, %v913_v0  ;;  %v908_v22 = vadd.f32 %v3334_v41, %v907_v10  ;;  %v660_v60 = vpop.f32.mrf.mxu0 }
 0x16d   : > { %v1163_v0 = vpack.c.bf16 %v3493_v49, %v3486_v36  ;;  %v3499_v5 = vadd.f32 %v3355_v55, %v660_v60 }
 0x16e   : > { %v1180_v32 = vpack.c.bf16 %v908_v22, %v905_v18  ;;  %2514 = vmatprep.subr.bf16.mxu0 %v1181_v58  ;;  %v2384_v10 = vpop.f32.mrf.mxu0 }
 0x16f   : > { %2491 = vmatpush3.bf16.xpose.msra.mxu1 %v1169_v37  ;;  %2515 = vmatpush3.bf16.xpose.msra.mxu0 %v1181_v58  ;;  %v897_v37 = vadd.f32 %v2428_v13, %v3334_v41  ;;  %v1162_v21 = vpack.c.bf16 %v3499_v5, %v3489_v53  ;;  %v3504_v16 = vadd.f32 %v2384_v10, %v3355_v55 }
 0x170   : > { %2492 = vmatprep.subr.bf16.mxu1 %v1168_v31  ;;  %2516 = vmatprep.subr.bf16.mxu0 %v1180_v32  ;;  %v673_v13 = vpop.f32.mrf.mxu0  ;;  %v892_v58 = vadd.f32 %v3334_v41, %v891_v26 }
 0x171   : > { %v1179_v6 = vpack.c.bf16 %v900_v40, %v897_v37  ;;  %v3508_v18 = vadd.f32 %v3355_v55, %v673_v13  ;;  %v884_v37 = vadd.f32 %v3424_v2, %v3334_v41  ;;  %v873_v2 = vadd.f32 %v3334_v41, %v3417_v61 }
 0x172   : > { %v2385_v22 = vpop.f32.mrf.mxu0 }
 0x173   : > { %v3512_v25 = vadd.f32 %v2385_v22, %v3355_v55 }
 0x175   : > { %v1165_v33 = vpack.c.bf16 %v3512_v25, %v3504_v16 }
 0x177   : > { %2493 = vmatpush3.bf16.xpose.msra.mxu1 %v1168_v31  ;;  %2517 = vmatpush3.bf16.xpose.msra.mxu0 %v1180_v32  ;;  %v889_v31 = vadd.f32 %v3334_v41, %v3443_v63  ;;  %v676_v32 = vpop.f32.mrf.mxu0 }
 0x178   : > { %2494 = vmatprep.subr.bf16.mxu1 %v3339_v48  ;;  %2518 = vmatprep.subr.bf16.mxu0 %v1179_v6  ;;  %v3519_v38 = vadd.f32 %v3355_v55, %v676_v32  ;;  %v881_v55 = vadd.f32 %v3408_v45, %v3334_v41 }
 0x179   : > { %v1178_v40 = vpack.c.bf16 %v892_v58, %v889_v31  ;;  %v3521_v44 = vpop.f32.mrf.mxu0  ;;  %v876_v58 = vadd.f32 %v3334_v41, %v3431_v7  ;;  %v3554_v41 = vld [vmem:[%s4052_s4 + $0x2] ss:$0 sm:$0xff] }
 0x17a   : > { %v1164_v26 = vpack.c.bf16 %v3519_v38, %v3508_v18  ;;  %v1032_v62 = vadd.f32 %v3521_v44, %v3554_v41 }
 0x17b   : > { %v3527_v63 = vpop.f32.mrf.mxu0  ;;  %v1176_v32 = vpack.c.bf16 %v876_v58, %v873_v2 }
 0x17d   : > { %v3531_v60 = vpop.f32.mrf.mxu0 }
 0x17e   : > { %v1035_v8 = vadd.f32 %v3531_v60, %v3554_v41 }
 0x17f   : > { %2495 = vmatpush3.bf16.xpose.msra.mxu1 %v3339_v48  ;;  %2519 = vmatpush3.bf16.xpose.msra.mxu0 %v1179_v6  ;;  %v3535_v10 = vpop.f32.mrf.mxu0  ;;  %v1177_v48 = vpack.c.bf16 %v884_v37, %v881_v55 }
 0x180   : > { %2496 = vmatprep.subr.bf16.mxu1 %v3344_v51  ;;  %2520 = vmatprep.subr.bf16.mxu0 %v1178_v40  ;;  %v1183_v55 = vpack.c.bf16 %v1035_v8, %v1032_v62  ;;  %v1027_v20 = vadd.f32 %v3554_v41, %v3535_v10 }
 0x181   : > { %v2456_v6 = vpop.f32.mrf.mxu0 }
 0x182   : > { %v1048_v39 = vadd.f32 %v2456_v6, %v3554_v41 }
 0x183   : > { %v1039_v13 = vpop.f32.mrf.mxu0 }
 0x184   : > { %v1040_v3 = vadd.f32 %v3554_v41, %v1039_v13 }
 0x185   : > { %v2457_v22 = vpop.f32.mrf.mxu0 }
 0x187   : > { %2497 = vmatpush3.bf16.xpose.msra.mxu1 %v3344_v51  ;;  %2521 = vmatpush3.bf16.xpose.msra.mxu0 %v1178_v40  ;;  %v1042_v31 = vpop.f32.mrf.mxu0 }
 0x188   : > { %2522 = vmatprep.subr.bf16.mxu0 %v1177_v48 }
 0x189   : > { %v2460_v45 = vpop.f32.mrf.mxu0 }
 0x18a   : > { %v1064_v34 = vadd.f32 %v2460_v45, %v3554_v41 }
 0x18b   : > { %v1055_v51 = vpop.f32.mrf.mxu0 }
 0x18d   : > { %v2461_v40 = vpop.f32.mrf.mxu0 }
 0x18e   : > { %2499 = vmatmul.mubr.bf16.vlgmr.msra.gmra.mxu1 %v1151_v4  ;;  %v1067_v47 = vadd.f32 %v2461_v40, %v3554_v41 }
 0x18f   : > { %2523 = vmatpush3.bf16.xpose.msra.mxu0 %v1177_v48  ;;  %2502 = vmatprep.mubr.bf16.mxu1 %v1152_v29  ;;  %v1058_v7 = vpop.f32.mrf.mxu0 }
 0x190   : > { %2524 = vmatprep.subr.bf16.mxu0 %v1176_v32  ;;  %v1187_v37 = vpack.c.bf16 %v1067_v47, %v1064_v34  ;;  %v1059_v30 = vadd.f32 %v3554_v41, %v1058_v7 }
 0x191   : > { %v2464_v59 = vpop.f32.mrf.mxu0 }
 0x192   : > { %v1080_v4 = vadd.f32 %v2464_v59, %v3554_v41 }
 0x193   : > { %v1071_v1 = vpop.f32.mrf.mxu0 }
 0x194   : > { %v1072_v9 = vadd.f32 %v3554_v41, %v1071_v1  ;;  %v1392_v1 = vlaneseq }
 0x195   : > { %v2465_v12 = vpop.f32.mrf.mxu0 }
 0x196   : > { %2503 = vmatmul.mubr.bf16.gmra.mxu1 %v1153_v23  ;;  %v1083_v17 = vadd.f32 %v2465_v12, %v3554_v41 }
 0x197   : > { %2525 = vmatpush3.bf16.xpose.msra.mxu0 %v1176_v32  ;;  %2506 = vmatprep.mubr.bf16.mxu1 %v1154_v56  ;;  %v1074_v23 = vpop.f32.mrf.mxu0  ;;  %v1056_v56 = vadd.f32 %v3554_v41, %v1055_v51 }
 0x198   : > { %2526 = vmatprep.subr.bf16.mxu0 %v3405_v42  ;;  %v1189_v24 = vpack.c.bf16 %v1083_v17, %v1080_v4  ;;  %v1075_v29 = vadd.f32 %v3554_v41, %v1074_v23  ;;  %v3644_v4 = vshrl.u32 %v1392_v1, 7 }
 0x19a   : > { %v1188_v61 = vpack.c.bf16 %v1075_v29, %v1072_v9  ;;  %2546 = vmatprep.subr.bf16.mxu1 %v1189_v24  ;;  %v3647_v12 = vadd.s32 16, %v3644_v4  ;;  %v3649_v9 = vand.u32 127, %v1392_v1  ;;  %v3654_v17 = vadd.s32 24, %v3644_v4 }
 0x19b   : > { %2547 = vmatpush3.bf16.msra.mxu1 %v1189_v24  ;;  %v3659_v24 = vadd.s32 8, %v3644_v4  ;;  %v3711_v8 = vadd.s32 56, %v3644_v4 }
 0x19c   : > { %2548 = vmatprep.subr.bf16.mxu1 %v1188_v61  ;;  %vm1413_vm0 = vcmp.ge.s32.totalorder %v3647_v12, %v3649_v9  ;;  %vm1411_vm1 = vcmp.ge.s32.totalorder %v3644_v4, %v3649_v9  ;;  %vm1414_vm2 = vcmp.ge.s32.totalorder %v3654_v17, %v3649_v9 }
 0x19d   : > { %vm1412_vm3 = vcmp.ge.s32.totalorder %v3659_v24, %v3649_v9  ;;  %vm1418_vm7 = vcmp.ge.s32.totalorder %v3711_v8, %v3649_v9 }
 0x19e   : > { %2507 = vmatmul.mubr.bf16.gmra.mxu1 %v1155_v46  ;;  %v1186_v46 = vpack.c.bf16 %v1059_v30, %v1056_v56  ;;  %v3678_v56 = vadd.s32 32, %v3644_v4 }
 0x19f   : > { %2527 = vmatpush3.bf16.xpose.msra.mxu0 %v3405_v42  ;;  %2510 = vmatprep.mubr.bf16.mxu1 %v1156_v19  ;;  %v1051_v42 = vadd.f32 %v2457_v22, %v3554_v41  ;;  %v1043_v19 = vadd.f32 %v3554_v41, %v1042_v31 }
 0x1a0   : > { %2528 = vmatprep.subr.bf16.mxu0 %v3415_v57  ;;  %2549 = vmatpush3.bf16.msra.mxu1 %v1188_v61  ;;  %vm1415_vm4 = vcmp.ge.s32.totalorder %v3678_v56, %v3649_v9 }
 0x1a1   : > { %2550 = vmatprep.subr.bf16.mxu1 %v1187_v37  ;;  %v1185_v15 = vpack.c.bf16 %v1051_v42, %v1048_v39 }
 0x1a4   : > { %2551 = vmatpush3.bf16.msra.mxu1 %v1187_v37 }
 0x1a5   : > { %2552 = vmatprep.subr.bf16.mxu1 %v1186_v46 }
 0x1a6   : > { %2511 = vmatmul.mubr.bf16.gmra.mxu1 %v1157_v14  ;;  %v1184_v14 = vpack.c.bf16 %v1043_v19, %v1040_v3  ;;  %v3698_v3 = vadd.s32 40, %v3644_v4 }
 0x1a7   : > { %2529 = vmatpush3.bf16.xpose.msra.mxu0 %v3415_v57  ;;  %v1024_v57 = vadd.f32 %v3554_v41, %v3527_v63 }
 0x1a8   : > { %2553 = vmatpush3.bf16.msra.mxu1 %v1186_v46  ;;  %v3695_v46 = vadd.s32 48, %v3644_v4  ;;  %vm1416_vm6 = vcmp.ge.s32.totalorder %v3698_v3, %v3649_v9 }
 0x1a9   : > { %2554 = vmatprep.subr.bf16.mxu1 %v1185_v15  ;;  %v1182_v28 = vpack.c.bf16 %v1027_v20, %v1024_v57 }
 0x1aa   : > { %vm1417_vm5 = vcmp.ge.s32.totalorder %v3695_v46, %v3649_v9 }
 0x1ac   : > { %2555 = vmatpush3.bf16.msra.mxu1 %v1185_v15 }
 0x1ad   : > { %2556 = vmatprep.subr.bf16.mxu1 %v1184_v14 }
 0x1ae   : > { %2531 = vmatmul.mubr.bf16.vlgmr.msra.gmra.mxu0 %v1159_v35  ;;  %v2468_v35 = vpop.f32.mrf.mxu0 }
 0x1af   : > { %2534 = vmatprep.mubr.bf16.mxu0 %v1160_v52  ;;  %v1096_v50 = vadd.f32 %v2468_v35, %v3554_v41  ;;  %v3733_v35 = vadd.s32 80, %v3644_v4 }
 0x1b0   : > { %2557 = vmatpush3.bf16.msra.mxu1 %v1184_v14  ;;  %v1087_v43 = vpop.f32.mrf.mxu0  ;;  %v3714_v14 = vadd.s32 64, %v3644_v4 }
 0x1b1   : > { %2558 = vmatprep.subr.bf16.mxu1 %v1183_v55  ;;  %vm1421_vm9 = vcmp.ge.s32.totalorder %v3733_v35, %v3649_v9 }
 0x1b2   : > { %v2469_v11 = vpop.f32.mrf.mxu0  ;;  %vm1419_vm8 = vcmp.ge.s32.totalorder %v3714_v14, %v3649_v9 }
 0x1b3   : > { %v1099_v27 = vadd.f32 %v2469_v11, %v3554_v41 }
 0x1b4   : > { %2559 = vmatpush3.bf16.msra.mxu1 %v1183_v55  ;;  %v1090_v52 = vpop.f32.mrf.mxu0 }
 0x1b5   : > { %2560 = vmatprep.subr.bf16.mxu1 %v1182_v28  ;;  %v3616_v36 = vpack.c.bf16 %v1099_v27, %v1096_v50  ;;  %v1091_v53 = vadd.f32 %v3554_v41, %v1090_v52  ;;  %v3755_v52 = vadd.s32 88, %v3644_v4 }
 0x1b6   : > { %2535 = vmatmul.mubr.bf16.gmra.mxu0 %v1161_v54  ;;  %v1088_v54 = vadd.f32 %v3554_v41, %v1087_v43  ;;  %v2472_v49 = vpop.f32.mrf.mxu0  ;;  %v3736_v43 = vadd.s32 72, %v3644_v4 }
 0x1b7   : > { %2538 = vmatprep.mubr.bf16.mxu0 %v1162_v21  ;;  %v1112_v21 = vadd.f32 %v2472_v49, %v3554_v41  ;;  %vm1422_vm11 = vcmp.ge.s32.totalorder %v3755_v52, %v3649_v9 }
 0x1b8   : > { %2561 = vmatpush3.bf16.msra.mxu1 %v1182_v28  ;;  %v1103_v5 = vpop.f32.mrf.mxu0  ;;  %vm1420_vm10 = vcmp.ge.s32.totalorder %v3736_v43, %v3649_v9 }
 0x1b9   : > { %v1104_v18 = vadd.f32 %v3554_v41, %v1103_v5 }
 0x1ba   : > { %v2473_v16 = vpop.f32.mrf.mxu0 }
 0x1bb   : > { %v1115_v25 = vadd.f32 %v2473_v16, %v3554_v41 }
 0x1bd   : > { %v3624_v38 = vpack.c.bf16 %v1115_v25, %v1112_v21  ;;  %v3780_v25 = vadd.s32 104, %v3644_v4 }
 0x1be   : > { %2539 = vmatmul.mubr.bf16.gmra.mxu0 %v1163_v0  ;;  %v3619_v0 = vpack.c.bf16 %v1091_v53, %v1088_v54  ;;  %v3758_v53 = vadd.s32 96, %v3644_v4 }
 0x1bf   : > { %2542 = vmatprep.mubr.bf16.mxu0 %v1164_v26  ;;  %vm1424_vm14 = vcmp.ge.s32.totalorder %v3780_v25, %v3649_v9 }
 0x1c0   : > { %vm1423_vm12 = vcmp.ge.s32.totalorder %v3758_v53, %v3649_v9 }
 0x1c6   : > { %2543 = vmatmul.mubr.bf16.gmra.mxu0 %v1165_v33  ;;  %v1106_v33 = vpop.f32.mrf.mxu0 }
 0x1c7   : > { %v1107_v44 = vadd.f32 %v3554_v41, %v1106_v33 }
 0x1c8   : > { %v2476_v26 = vpop.f32.mrf.mxu0 }
 0x1c9   : > { %v3627_v63 = vpack.c.bf16 %v1107_v44, %v1104_v18  ;;  %v1128_v10 = vadd.f32 %v2476_v26, %v3554_v41  ;;  %v3777_v18 = vadd.s32 112, %v3644_v4 }
 0x1ca   : > { %v1119_v60 = vpop.f32.mrf.mxu0 }
 0x1cb   : > { %v1120_v6 = vadd.f32 %v3554_v41, %v1119_v60  ;;  %vm1425_vm13 = vcmp.ge.s32.totalorder %v3777_v18, %v3649_v9 }
 0x1cc   : > { %v2477_v48 = vpop.f32.mrf.mxu0 }
 0x1cd   : > { %v1131_v13 = vadd.f32 %v2477_v48, %v3554_v41 }
 0x1ce   : > { %v1122_v58 = vpop.f32.mrf.mxu0 }
 0x1cf   : > { %v3632_v22 = vpack.c.bf16 %v1131_v13, %v1128_v10  ;;  %v1123_v2 = vadd.f32 %v3554_v41, %v1122_v58  ;;  %v1408_v10 = vadd.s32 120, %v3644_v4 }
 0x1d0   : > { %v2480_v31 = vpop.f32.mrf.mxu0 }
 0x1d1   : > { %v3635_v32 = vpack.c.bf16 %v1123_v2, %v1120_v6  ;;  %v1144_v51 = vadd.f32 %v2480_v31, %v3554_v41  ;;  %vm1426_vm15 = vcmp.ge.s32.totalorder %v1408_v10, %v3649_v9 }
 0x1d2   : > { %v3637_v45 = vpop.f32.mrf.mxu0 }
 0x1d4   : > { %v2481_v40 = vpop.f32.mrf.mxu0 }
 0x1d5   : > { %v1147_v7 = vadd.f32 %v2481_v40, %v3554_v41 }
 0x1d6   : > { %v3799_v48 = vpop.f32.mrf.mxu0 }
 0x1d7   : > { %v3641_v59 = vpack.c.bf16 %v1147_v7, %v1144_v51 }
 0x1d9   : > { %2578 = vmatprep.subr.bf16.mxu1 %v3641_v59 }
 0x24e   : > { %v2500_v23 = vpop.f32.mrf.mxu1 }
 0x24f   : > { %v3664_v29 = vsel %vm1413_vm0, %v2500_v23, -1e+30 }
 0x250   : > { %1463 = vmax.xlane.f32.xlu1 %v3664_v29  ;;  %v1232_v34 = vpop.f32.mrf.mxu1 }
 0x251   : > { %v3672_v47 = vsel %vm1411_vm1, %v1232_v34, -1e+30 }
 0x252   : > { %1459 = vmax.xlane.f32.xlu0 %v3672_v47  ;;  %v2501_v61 = vpop.f32.mrf.mxu1 }
 0x253   : > { %v3683_v37 = vsel %vm1414_vm2, %v2501_v61, -1e+30 }
 0x254   : > { %1465 = vmax.xlane.f32.xlu1 %v3683_v37  ;;  %v1235_v30 = vpop.f32.mrf.mxu1 }
 0x255   : > { %v3689_v39 = vsel %vm1412_vm3, %v1235_v30, -1e+30 }
 0x256   : > { %1461 = vmax.xlane.f32.xlu0 %v3689_v39  ;;  %v2504_v42 = vpop.f32.mrf.mxu1 }
 0x257   : > { %v3719_v55 = vsel %vm1417_vm5, %v2504_v42, -1e+30 }
 0x258   : > { %v1248_v15 = vpop.f32.mrf.mxu1 }
 0x259   : > { %v3703_v19 = vsel %vm1415_vm4, %v1248_v15, -1e+30 }
 0x25a   : > { %1467 = vmax.xlane.f32.xlu0 %v3703_v19  ;;  %v2505_v62 = vpop.f32.mrf.mxu1 }
 0x25b   : > { %v3741_v11 = vsel %vm1418_vm7, %v2505_v62, -1e+30 }
 0x25c   : > { %v1251_v57 = vpop.f32.mrf.mxu1 }
 0x25d   : > { %v3724_v20 = vsel %vm1416_vm6, %v1251_v57, -1e+30 }
 0x25e   : > { %1471 = vmax.xlane.f32.xlu0 %v3719_v55  ;;  %1469 = vmax.xlane.f32.xlu1 %v3724_v20  ;;  %v2508_v28 = vpop.f32.mrf.mxu1 }
 0x25f   : > { %v3763_v5 = vsel %vm1421_vm9, %v2508_v28, -1e+30 }
 0x260   : > { %v1264_v50 = vpop.f32.mrf.mxu1 }
 0x261   : > { %v3746_v54 = vsel %vm1419_vm8, %v1264_v50, -1e+30 }
 0x262   : > { %1473 = vmax.xlane.f32.xlu1 %v3741_v11  ;;  %1475 = vmax.xlane.f32.xlu0 %v3746_v54  ;;  %v2509_v27 = vpop.f32.mrf.mxu1 }
 0x263   : > { %v3785_v44 = vsel %vm1422_vm11, %v2509_v27, -1e+30 }
 0x264   : > { %v1267_v49 = vpop.f32.mrf.mxu1 }
 0x265   : > { %v3768_v21 = vsel %vm1420_vm10, %v1267_v49, -1e+30 }
 0x266   : > { %1479 = vmax.xlane.f32.xlu0 %v3763_v5  ;;  %1477 = vmax.xlane.f32.xlu1 %v3768_v21  ;;  %v2512_v16 = vpop.f32.mrf.mxu1 }
 0x267   : > { %v3804_v13 = vsel %vm1425_vm13, %v2512_v16, -1e+30 }
 0x268   : > { %v1280_v33 = vpop.f32.mrf.mxu1 }
 0x269   : > { %v3790_v26 = vsel %vm1423_vm12, %v1280_v33, -1e+30 }
 0x26a   : > { %1481 = vmax.xlane.f32.xlu1 %v3785_v44  ;;  %1483 = vmax.xlane.f32.xlu0 %v3790_v26  ;;  %v2513_v60 = vpop.f32.mrf.mxu1 }
 0x26b   : > { %v3821_v40 = vsel %vm1426_vm15, %v2513_v60, -1e+30 }
 0x26c   : > { %v1283_v6 = vpop.f32.mrf.mxu1 }
 0x26d   : > { %v3809_v58 = vsel %vm1424_vm14, %v1283_v6, -1e+30 }
 0x26e   : > { %v2532_v2 = vpop.f32.mrf.mxu0  ;;  %1487 = vmax.xlane.f32.xlu0 %v3804_v13  ;;  %1485 = vmax.xlane.f32.xlu1 %v3809_v58 }
 0x26f   : > { %v3828_v23 = vsel %vm1413_vm0, %v2532_v2, -1e+30 }
 0x270   : > { %v1329_v31 = vpop.f32.mrf.mxu0 }
 0x271   : > { %v3817_v51 = vsel %vm1411_vm1, %v1329_v31, -1e+30 }
 0x272   : > { %v2533_v7 = vpop.f32.mrf.mxu0  ;;  %1491 = vmax.xlane.f32.xlu0 %v3817_v51  ;;  %1489 = vmax.xlane.f32.xlu1 %v3821_v40 }
 0x273   : > { %v3845_v12 = vsel %vm1414_vm2, %v2533_v7, -1e+30 }
 0x274   : > { %v1332_v1 = vpop.f32.mrf.mxu0 }
 0x275   : > { %v3833_v4 = vsel %vm1412_vm3, %v1332_v1, -1e+30 }
 0x276   : > { %v2536_v34 = vpop.f32.mrf.mxu0  ;;  %1495 = vmax.xlane.f32.xlu0 %v3828_v23  ;;  %1493 = vmax.xlane.f32.xlu1 %v3833_v4 }
 0x277   : > { %v3852_v15 = vsel %vm1417_vm5, %v2536_v34, -1e+30 }
 0x278   : > { %v1345_v61 = vpop.f32.mrf.mxu0 }
 0x279   : > { %v3840_v30 = vsel %vm1415_vm4, %v1345_v61, -1e+30 }
 0x27a   : > { %v2537_v42 = vpop.f32.mrf.mxu0  ;;  %1499 = vmax.xlane.f32.xlu0 %v3840_v30  ;;  %1497 = vmax.xlane.f32.xlu1 %v3845_v12 }
 0x27b   : > { %v3869_v46 = vsel %vm1418_vm7, %v2537_v42, -1e+30 }
 0x27c   : > { %v1348_v24 = vpop.f32.mrf.mxu0 }
 0x27d   : > { %v3857_v56 = vsel %vm1416_vm6, %v1348_v24, -1e+30 }
 0x27e   : > { %v2540_v62 = vpop.f32.mrf.mxu0  ;;  %1503 = vmax.xlane.f32.xlu0 %v3852_v15  ;;  %1501 = vmax.xlane.f32.xlu1 %v3857_v56 }
 0x27f   : > { %v3876_v50 = vsel %vm1421_vm9, %v2540_v62, -1e+30 }
 0x280   : > { %v1361_v17 = vpop.f32.mrf.mxu0 }
 0x281   : > { %v3864_v57 = vsel %vm1419_vm8, %v1361_v17, -1e+30 }
 0x282   : > { %v2541_v28 = vpop.f32.mrf.mxu0  ;;  %1507 = vmax.xlane.f32.xlu0 %v3864_v57  ;;  %1505 = vmax.xlane.f32.xlu1 %v3869_v46 }
 0x283   : > { %v3893_v35 = vsel %vm1422_vm11, %v2541_v28, -1e+30 }
 0x284   : > { %v1364_v3 = vpop.f32.mrf.mxu0 }
 0x285   : > { %v3881_v14 = vsel %vm1420_vm10, %v1364_v3, -1e+30 }
 0x286   : > { %v2544_v27 = vpop.f32.mrf.mxu0  ;;  %1511 = vmax.xlane.f32.xlu0 %v3876_v50  ;;  %1509 = vmax.xlane.f32.xlu1 %v3881_v14 }
 0x287   : > { %v3900_v33 = vsel %vm1425_vm13, %v2544_v27, -1e+30 }
 0x288   : > { %v1377_v8 = vpop.f32.mrf.mxu0 }
 0x289   : > { %v3888_v49 = vsel %vm1423_vm12, %v1377_v8, -1e+30 }
 0x28a   : > { %v2545_v16 = vpop.f32.mrf.mxu0  ;;  %1515 = vmax.xlane.f32.xlu0 %v3888_v49  ;;  %1513 = vmax.xlane.f32.xlu1 %v3893_v35 }
 0x28b   : > { %v3911_v52 = vsel %vm1426_vm15, %v2545_v16, -1e+30 }
 0x28c   : > { %v1380_v43 = vpop.f32.mrf.mxu0 }
 0x28d   : > { %v3905_v53 = vsel %vm1424_vm14, %v1380_v43, -1e+30 }
 0x28e   : > { %1519 = vmax.xlane.f32.xlu0 %v3900_v33  ;;  %1517 = vmax.xlane.f32.xlu1 %v3905_v53 }
 0x292   : > { %1521 = vmax.xlane.f32.xlu1 %v3911_v52 }
 0x2d9   : > { %v1464_v60 = vpop.xlane.xlu1 %1463 }
 0x2da   : > { %v1525_v18 = vsub.f32 %v3664_v29, %v1464_v60 }
 0x2db   : > { %v1460_v6 = vpop.xlane.xlu0 %1459 }
 0x2dc   : > { %v1559_v2 = vmul.f32 1.442695, %v1525_v18  ;;  %v1523_v31 = vsub.f32 %v3672_v47, %v1460_v6 }
 0x2dd   : > { %v1466_v25 = vpop.xlane.xlu1 %1465 }
 0x2de   : > { %2689 = vpow2.f32 %v1559_v2  ;;  %v1555_v7 = vmul.f32 1.442695, %v1523_v31  ;;  %v1526_v1 = vsub.f32 %v3683_v37, %v1466_v25 }
 0x2df   : > { %v1462_v34 = vpop.xlane.xlu0 %1461 }
 0x2e0   : > { %v1561_v61 = vmul.f32 1.442695, %v1526_v1  ;;  %v1524_v9 = vsub.f32 %v3689_v39, %v1462_v34  ;;  %2691 = vpow2.f32 %v1555_v7 }
 0x2e2   : > { %2693 = vpow2.f32 %v1561_v61  ;;  %v1557_v10 = vmul.f32 1.442695, %v1524_v9 }
 0x2e3   : > { %v1468_v42 = vpop.xlane.xlu0 %1467 }
 0x2e4   : > { %2695 = vpow2.f32 %v1557_v10  ;;  %v1527_v29 = vsub.f32 %v3703_v19, %v1468_v42 }
 0x2e6   : > { %v1563_v24 = vmul.f32 1.442695, %v1527_v29 }
 0x2e7   : > { %v1472_v62 = vpop.xlane.xlu0 %1471  ;;  %v1470_v17 = vpop.xlane.xlu1 %1469 }
 0x2e8   : > { %v1529_v47 = vsub.f32 %v3719_v55, %v1472_v62  ;;  %v1528_v28 = vsub.f32 %v3724_v20, %v1470_v17  ;;  %2697 = vpow2.f32 %v1563_v24 }
 0x2ea   : > { %v1567_v3 = vmul.f32 1.442695, %v1529_v47  ;;  %v1565_v37 = vmul.f32 1.442695, %v1528_v28 }
 0x2eb   : > { %v2690_v27 = vpop.eup %2689  ;;  %v1474_v8 = vpop.xlane.xlu1 %1473 }
 0x2ec   : > { %v1476_v39 = vpop.xlane.xlu0 %1475  ;;  %2699 = vpow2.f32 %v1567_v3  ;;  %v1530_v16 = vsub.f32 %v3741_v11, %v1474_v8  ;;  %1623 = vadd.xlane.f32.xlu0 %v2690_v27  ;;  %v1136_v11 = vadd.f32 %v3554_v41, %v3637_v45 }
 0x2ed   : > { %v1531_v43 = vsub.f32 %v3746_v54, %v1476_v39  ;;  %2701 = vpow2.f32 %v1565_v37  ;;  %v2692_v19 = vpop.eup %2691  ;;  %v1139_v54 = vadd.f32 %v3554_v41, %v3799_v48 }
 0x2ee   : > { %v1569_v60 = vmul.f32 1.442695, %v1530_v16 }
 0x2ef   : > { %v2694_v18 = vpop.eup %2693  ;;  %v1571_v6 = vmul.f32 1.442695, %v1531_v43  ;;  %v1478_v2 = vpop.xlane.xlu1 %1477  ;;  %v1196_v42 = vpack.c.bf16 %v1139_v54, %v1136_v11 }
 0x2f0   : > { %v1480_v55 = vpop.xlane.xlu0 %1479  ;;  %2703 = vpow2.f32 %v1569_v60  ;;  %v1532_v31 = vsub.f32 %v3768_v21, %v1478_v2  ;;  %1619 = vadd.xlane.f32.xlu0 %v2692_v19  ;;  %1625 = vadd.xlane.f32.xlu1 %v2694_v18  ;;  %v1684_v10 = vpack.c.bf16 %v2694_v18, %v2690_v27 }
 0x2f1   : > { %v1533_v20 = vsub.f32 %v3763_v5, %v1480_v55  ;;  %v2696_v25 = vpop.eup %2695  ;;  %2705 = vpow2.f32 %v1571_v6 }
 0x2f2   : > { %v1573_v1 = vmul.f32 1.442695, %v1532_v31  ;;  %v1683_v34 = vpack.c.bf16 %v2696_v25, %v2692_v19 }
 0x2f3   : > { %v1575_v7 = vmul.f32 1.442695, %v1533_v20  ;;  %v1482_v61 = vpop.xlane.xlu1 %1481 }
 0x2f4   : > { %v1484_v9 = vpop.xlane.xlu0 %1483  ;;  %v1534_v5 = vsub.f32 %v3785_v44, %v1482_v61  ;;  %2562 = vmatprep.mubr.bf16.mxu1 %v1683_v34  ;;  %1621 = vadd.xlane.f32.xlu1 %v2696_v25 }
 0x2f5   : > { %2707 = vpow2.f32 %v1575_v7  ;;  %v1535_v21 = vsub.f32 %v3790_v26, %v1484_v9  ;;  %2563 = vmatmul.mubr.bf16.vlgmr.msra.gmra.mxu1 %v1684_v10  ;;  %v2698_v24 = vpop.eup %2697 }
 0x2f6   : > { %2709 = vpow2.f32 %v1573_v1  ;;  %v1577_v45 = vmul.f32 1.442695, %v1534_v5  ;;  %2579 = vmatpush3.bf16.msra.mxu1 %v3641_v59 }
 0x2f7   : > { %v1579_v41 = vmul.f32 1.442695, %v1535_v21  ;;  %2580 = vmatprep.subr.bf16.mxu1 %v1196_v42  ;;  %v1486_v29 = vpop.xlane.xlu1 %1485 }
 0x2f8   : > { %v1488_v48 = vpop.xlane.xlu0 %1487  ;;  %2711 = vpow2.f32 %v1577_v45  ;;  %v1536_v44 = vsub.f32 %v3809_v58, %v1486_v29 }
 0x2f9   : > { %v1537_v62 = vsub.f32 %v3804_v13, %v1488_v48  ;;  %v2700_v17 = vpop.eup %2699  ;;  %2713 = vpow2.f32 %v1579_v41 }
 0x2fa   : > { %v2702_v26 = vpop.eup %2701  ;;  %v1581_v28 = vmul.f32 1.442695, %v1536_v44  ;;  %2581 = vmatpush3.bf16.msra.mxu1 %v1196_v42  ;;  %1631 = vadd.xlane.f32.xlu0 %v2700_v17 }
 0x2fb   : > { %v1583_v47 = vmul.f32 1.442695, %v1537_v62  ;;  %2582 = vmatprep.subr.bf16.mxu1 %v3632_v22  ;;  %v1490_v3 = vpop.xlane.xlu1 %1489  ;;  %v1685_v37 = vpack.c.bf16 %v2702_v26, %v2698_v24 }
 0x2fc   : > { %v1492_v59 = vpop.xlane.xlu0 %1491  ;;  %v1538_v8 = vsub.f32 %v3821_v40, %v1490_v3 }
 0x2fd   : > { %2715 = vpow2.f32 %v1583_v47  ;;  %v1539_v27 = vsub.f32 %v3817_v51, %v1492_v59  ;;  %v2704_v13 = vpop.eup %2703  ;;  %2566 = vmatprep.mubr.bf16.mxu1 %v1685_v37 }
 0x2fe   : > { %2717 = vpow2.f32 %v1581_v28  ;;  %v1585_v58 = vmul.f32 1.442695, %v1538_v8  ;;  %2583 = vmatpush3.bf16.msra.mxu1 %v3632_v22  ;;  %1627 = vadd.xlane.f32.xlu0 %v2698_v24  ;;  %v1686_v39 = vpack.c.bf16 %v2704_v13, %v2700_v17  ;;  %v2706_v60 = vpop.eup %2705 }
 0x2ff   : > { %v1587_v16 = vmul.f32 1.442695, %v1539_v27  ;;  %2584 = vmatprep.subr.bf16.mxu1 %v3635_v32  ;;  %1633 = vadd.xlane.f32.xlu1 %v2704_v13  ;;  %v1494_v19 = vpop.xlane.xlu1 %1493 }
 0x300   : > { %v1496_v43 = vpop.xlane.xlu0 %1495  ;;  %v1540_v51 = vsub.f32 %v3833_v4, %v1494_v19  ;;  %2567 = vmatmul.mubr.bf16.gmra.mxu1 %v1686_v39  ;;  %2719 = vpow2.f32 %v1585_v58 }
 0x301   : > { %v1541_v18 = vsub.f32 %v3828_v23, %v1496_v43  ;;  %2721 = vpow2.f32 %v1587_v16 }
 0x302   : > { %v2708_v40 = vpop.eup %2707  ;;  %v1589_v2 = vmul.f32 1.442695, %v1540_v51  ;;  %2585 = vmatpush3.bf16.msra.mxu1 %v3635_v32 }
 0x303   : > { %v2710_v6 = vpop.eup %2709  ;;  %v1591_v55 = vmul.f32 1.442695, %v1541_v18  ;;  %1639 = vadd.xlane.f32.xlu0 %v2708_v40  ;;  %2586 = vmatprep.subr.bf16.mxu1 %v3624_v38  ;;  %v1498_v20 = vpop.xlane.xlu1 %1497 }
 0x304   : > { %1629 = vadd.xlane.f32.xlu1 %v2702_v26  ;;  %v1500_v22 = vpop.xlane.xlu0 %1499  ;;  %v1687_v31 = vpack.c.bf16 %v2710_v6, %v2706_v60  ;;  %v1542_v4 = vsub.f32 %v3845_v12, %v1498_v20 }
 0x305   : > { %2723 = vpow2.f32 %v1591_v55  ;;  %v1543_v23 = vsub.f32 %v3840_v30, %v1500_v22  ;;  %v2712_v25 = vpop.eup %2711 }
 0x306   : > { %2725 = vpow2.f32 %v1589_v2  ;;  %2570 = vmatprep.mubr.bf16.mxu1 %v1687_v31  ;;  %v1593_v11 = vmul.f32 1.442695, %v1542_v4  ;;  %2587 = vmatpush3.bf16.msra.mxu1 %v3624_v38  ;;  %v1688_v32 = vpack.c.bf16 %v2712_v25, %v2708_v40  ;;  %v2714_v34 = vpop.eup %2713 }
 0x307   : > { %1635 = vadd.xlane.f32.xlu0 %v2706_v60  ;;  %v1595_v54 = vmul.f32 1.442695, %v1543_v23  ;;  %2588 = vmatprep.subr.bf16.mxu1 %v3627_v63  ;;  %v1502_v1 = vpop.xlane.xlu1 %1501 }
 0x308   : > { %1641 = vadd.xlane.f32.xlu1 %v2712_v25  ;;  %v1504_v7 = vpop.xlane.xlu0 %1503  ;;  %v1544_v30 = vsub.f32 %v3857_v56, %v1502_v1  ;;  %2571 = vmatmul.mubr.bf16.gmra.mxu1 %v1688_v32  ;;  %2727 = vpow2.f32 %v1593_v11 }
 0x309   : > { %v1545_v61 = vsub.f32 %v3852_v15, %v1504_v7  ;;  %2729 = vpow2.f32 %v1595_v54 }
 0x30a   : > { %v2716_v12 = vpop.eup %2715  ;;  %v1597_v5 = vmul.f32 1.442695, %v1544_v30  ;;  %2589 = vmatpush3.bf16.msra.mxu1 %v3627_v63 }
 0x30b   : > { %v2718_v9 = vpop.eup %2717  ;;  %v1599_v10 = vmul.f32 1.442695, %v1545_v61  ;;  %1647 = vadd.xlane.f32.xlu0 %v2716_v12  ;;  %2590 = vmatprep.subr.bf16.mxu1 %v3616_v36  ;;  %v1506_v21 = vpop.xlane.xlu1 %1505 }
 0x30c   : > { %1637 = vadd.xlane.f32.xlu1 %v2710_v6  ;;  %v1508_v38 = vpop.xlane.xlu0 %1507  ;;  %v1689_v42 = vpack.c.bf16 %v2718_v9, %v2714_v34  ;;  %v1546_v56 = vsub.f32 %v3869_v46, %v1506_v21 }
 0x30d   : > { %2731 = vpow2.f32 %v1599_v10  ;;  %v1547_v15 = vsub.f32 %v3864_v57, %v1508_v38  ;;  %v2720_v45 = vpop.eup %2719 }
 0x30e   : > { %2733 = vpow2.f32 %v1597_v5  ;;  %2574 = vmatprep.mubr.bf16.mxu1 %v1689_v42  ;;  %v1601_v41 = vmul.f32 1.442695, %v1546_v56  ;;  %2591 = vmatpush3.bf16.msra.mxu1 %v3616_v36  ;;  %v1690_v24 = vpack.c.bf16 %v2720_v45, %v2716_v12  ;;  %v2722_v62 = vpop.eup %2721 }
 0x30f   : > { %1643 = vadd.xlane.f32.xlu0 %v2714_v34  ;;  %v1603_v63 = vmul.f32 1.442695, %v1547_v15  ;;  %2592 = vmatprep.subr.bf16.mxu1 %v3619_v0  ;;  %v1510_v29 = vpop.xlane.xlu1 %1509 }
 0x310   : > { %1649 = vadd.xlane.f32.xlu1 %v2720_v45  ;;  %v1512_v48 = vpop.xlane.xlu0 %1511  ;;  %v1548_v57 = vsub.f32 %v3881_v14, %v1510_v29  ;;  %2735 = vpow2.f32 %v1601_v41  ;;  %2575 = vmatmul.mubr.bf16.gmra.mxu1 %v1690_v24 }
 0x311   : > { %v1549_v44 = vsub.f32 %v3876_v50, %v1512_v48  ;;  %2737 = vpow2.f32 %v1603_v63 }
 0x312   : > { %v2724_v46 = vpop.eup %2723  ;;  %v1605_v47 = vmul.f32 1.442695, %v1548_v57  ;;  %2593 = vmatpush3.bf16.msra.mxu1 %v3619_v0 }
 0x313   : > { %v2726_v17 = vpop.eup %2725  ;;  %v1607_v26 = vmul.f32 1.442695, %v1549_v44  ;;  %1655 = vadd.xlane.f32.xlu0 %v2724_v46  ;;  %v1514_v28 = vpop.xlane.xlu1 %1513 }
 0x314   : > { %1645 = vadd.xlane.f32.xlu1 %v2718_v9  ;;  %v1516_v36 = vpop.xlane.xlu0 %1515  ;;  %v1691_v59 = vpack.c.bf16 %v2726_v17, %v2722_v62  ;;  %v1550_v50 = vsub.f32 %v3893_v35, %v1514_v28 }
 0x315   : > { %2739 = vpow2.f32 %v1607_v26  ;;  %v1551_v3 = vsub.f32 %v3888_v49, %v1516_v36  ;;  %v2728_v14 = vpop.eup %2727 }
 0x316   : > { %2741 = vpow2.f32 %v1605_v47  ;;  %2594 = vmatprep.mubr.bf16.mxu1 %v1691_v59  ;;  %v1609_v37 = vmul.f32 1.442695, %v1550_v50  ;;  %v1692_v0 = vpack.c.bf16 %v2728_v14, %v2724_v46  ;;  %v2730_v13 = vpop.eup %2729 }
 0x317   : > { %1651 = vadd.xlane.f32.xlu0 %v2722_v62  ;;  %v1518_v8 = vpop.xlane.xlu1 %1517  ;;  %v1611_v58 = vmul.f32 1.442695, %v1551_v3 }
 0x318   : > { %1657 = vadd.xlane.f32.xlu1 %v2728_v14  ;;  %v1520_v27 = vpop.xlane.xlu0 %1519  ;;  %v1552_v16 = vsub.f32 %v3905_v53, %v1518_v8  ;;  %2743 = vpow2.f32 %v1609_v37  ;;  %2595 = vmatmul.mubr.bf16.vlgmr.msra.gmra.mxu1 %v1692_v0 }
 0x319   : > { %v1553_v39 = vsub.f32 %v3900_v33, %v1520_v27  ;;  %2745 = vpow2.f32 %v1611_v58 }
 0x31a   : > { %v2732_v43 = vpop.eup %2731  ;;  %v1613_v35 = vmul.f32 1.442695, %v1552_v16 }
 0x31b   : > { %v2734_v49 = vpop.eup %2733  ;;  %1663 = vadd.xlane.f32.xlu0 %v2732_v43  ;;  %v1615_v19 = vmul.f32 1.442695, %v1553_v39  ;;  %v1522_v60 = vpop.xlane.xlu1 %1521 }
 0x31c   : > { %1653 = vadd.xlane.f32.xlu1 %v2726_v17  ;;  %v1693_v18 = vpack.c.bf16 %v2734_v49, %v2730_v13  ;;  %v1554_v51 = vsub.f32 %v3911_v52, %v1522_v60  ;;  %2747 = vpow2.f32 %v1613_v35 }
 0x31d   : > { %v2736_v40 = vpop.eup %2735  ;;  %2749 = vpow2.f32 %v1615_v19 }
 0x31e   : > { %2598 = vmatprep.mubr.bf16.mxu1 %v1693_v18  ;;  %v1617_v6 = vmul.f32 1.442695, %v1554_v51  ;;  %v1694_v33 = vpack.c.bf16 %v2736_v40, %v2732_v43  ;;  %v2738_v53 = vpop.eup %2737 }
 0x31f   : > { %1659 = vadd.xlane.f32.xlu0 %v2730_v13 }
 0x320   : > { %1665 = vadd.xlane.f32.xlu1 %v2736_v40  ;;  %2751 = vpow2.f32 %v1617_v6  ;;  %2599 = vmatmul.mubr.bf16.gmra.mxu1 %v1694_v33 }
 0x322   : > { %v2740_v55 = vpop.eup %2739 }
 0x323   : > { %v2742_v2 = vpop.eup %2741  ;;  %1671 = vadd.xlane.f32.xlu0 %v2740_v55 }
 0x324   : > { %1661 = vadd.xlane.f32.xlu1 %v2734_v49  ;;  %v1695_v22 = vpack.c.bf16 %v2742_v2, %v2738_v53 }
 0x325   : > { %v2744_v20 = vpop.eup %2743 }
 0x326   : > { %2602 = vmatprep.mubr.bf16.mxu1 %v1695_v22  ;;  %v1696_v52 = vpack.c.bf16 %v2744_v20, %v2740_v55  ;;  %v2746_v31 = vpop.eup %2745 }
 0x327   : > { %1667 = vadd.xlane.f32.xlu0 %v2738_v53 }
 0x328   : > { %1673 = vadd.xlane.f32.xlu1 %v2744_v20  ;;  %2603 = vmatmul.mubr.bf16.gmra.mxu1 %v1696_v52 }
 0x329   : > { %v2748_v23 = vpop.eup %2747 }
 0x32a   : > { %v1697_v4 = vpack.c.bf16 %v2748_v23, %v2746_v31  ;;  %v2750_v25 = vpop.eup %2749 }
 0x32b   : > { %1675 = vadd.xlane.f32.xlu0 %v2746_v31 }
 0x32c   : > { %1669 = vadd.xlane.f32.xlu1 %v2742_v2  ;;  %2606 = vmatprep.mubr.bf16.mxu1 %v1697_v4 }
 0x32d   : > { %v2752_v11 = vpop.eup %2751 }
 0x32e   : > { %v1698_v32 = vpack.c.bf16 %v2752_v11, %v2750_v25 }
 0x32f   : > { %1679 = vadd.xlane.f32.xlu0 %v2750_v25 }
 0x330   : > { %1677 = vadd.xlane.f32.xlu1 %v2748_v23  ;;  %2607 = vmatmul.mubr.bf16.gmra.mxu1 %v1698_v32 }
 0x334   : > { %1681 = vadd.xlane.f32.xlu1 %v2752_v11 }
 0x375   : > { %v1624_v54 = vpop.xlane.xlu0 %1623 }
 0x376   : > { %2753 = vrcp.f32 %v1624_v54 }
 0x379   : > { %v1626_v7 = vpop.xlane.xlu1 %1625  ;;  %v1620_v1 = vpop.xlane.xlu0 %1619 }
 0x37a   : > { %2755 = vrcp.f32 %v1620_v1 }
 0x37b   : > { %2757 = vrcp.f32 %v1626_v7 }
 0x37d   : > { %v1622_v34 = vpop.xlane.xlu1 %1621 }
 0x37e   : > { %2759 = vrcp.f32 %v1622_v34 }
 0x383   : > { %v1632_v61 = vpop.xlane.xlu0 %1631  ;;  %v2754_v45 = vpop.eup %2753 }
 0x384   : > { %2761 = vrcp.f32 %v1632_v61 }
 0x387   : > { %v1628_v12 = vpop.xlane.xlu0 %1627  ;;  %v2756_v29 = vpop.eup %2755 }
 0x388   : > { %v1634_v30 = vpop.xlane.xlu1 %1633  ;;  %2763 = vrcp.f32 %v1628_v12  ;;  %v2758_v57 = vpop.eup %2757 }
 0x389   : > { %2765 = vrcp.f32 %v1634_v30 }
 0x38b   : > { %v2760_v26 = vpop.eup %2759 }
 0x38c   : > { %v1640_v10 = vpop.xlane.xlu0 %1639 }
 0x38d   : > { %v1630_v9 = vpop.xlane.xlu1 %1629 }
 0x38e   : > { %2767 = vrcp.f32 %v1630_v9 }
 0x38f   : > { %2769 = vrcp.f32 %v1640_v10 }
 0x390   : > { %v1636_v38 = vpop.xlane.xlu0 %1635 }
 0x391   : > { %v1642_v5 = vpop.xlane.xlu1 %1641  ;;  %2771 = vrcp.f32 %v1636_v38  ;;  %v2762_v3 = vpop.eup %2761 }
 0x392   : > { %2773 = vrcp.f32 %v1642_v5 }
 0x394   : > { %v1648_v42 = vpop.xlane.xlu0 %1647 }
 0x395   : > { %v1638_v21 = vpop.xlane.xlu1 %1637  ;;  %v2764_v27 = vpop.eup %2763 }
 0x396   : > { %2775 = vrcp.f32 %v1638_v21  ;;  %v2766_v58 = vpop.eup %2765 }
 0x397   : > { %2777 = vrcp.f32 %v1648_v42 }
 0x398   : > { %v1644_v56 = vpop.xlane.xlu0 %1643 }
 0x399   : > { %v1650_v15 = vpop.xlane.xlu1 %1649  ;;  %2779 = vrcp.f32 %v1644_v56 }
 0x39a   : > { %2781 = vrcp.f32 %v1650_v15 }
 0x39b   : > { %v2768_v43 = vpop.eup %2767 }
 0x39c   : > { %v1656_v24 = vpop.xlane.xlu0 %1655  ;;  %v2770_v60 = vpop.eup %2769 }
 0x39d   : > { %v1646_v41 = vpop.xlane.xlu1 %1645 }
 0x39e   : > { %v2772_v6 = vpop.eup %2771  ;;  %2783 = vrcp.f32 %v1646_v41 }
 0x39f   : > { %v2774_v55 = vpop.eup %2773  ;;  %2785 = vrcp.f32 %v1656_v24 }
 0x3a0   : > { %v1652_v59 = vpop.xlane.xlu0 %1651 }
 0x3a1   : > { %v1658_v47 = vpop.xlane.xlu1 %1657  ;;  %2787 = vrcp.f32 %v1652_v59 }
 0x3a2   : > { %2789 = vrcp.f32 %v1658_v47 }
 0x3a3   : > { %v2776_v52 = vpop.eup %2775 }
 0x3a4   : > { %v1664_v0 = vpop.xlane.xlu0 %1663  ;;  %v2778_v25 = vpop.eup %2777 }
 0x3a5   : > { %v1654_v14 = vpop.xlane.xlu1 %1653 }
 0x3a6   : > { %2791 = vrcp.f32 %v1654_v14  ;;  %v2780_v54 = vpop.eup %2779 }
 0x3a7   : > { %2793 = vrcp.f32 %v1664_v0  ;;  %v2782_v61 = vpop.eup %2781 }
 0x3a8   : > { %v1660_v51 = vpop.xlane.xlu0 %1659 }
 0x3a9   : > { %v1666_v35 = vpop.xlane.xlu1 %1665  ;;  %2795 = vrcp.f32 %v1660_v51 }
 0x3aa   : > { %2797 = vrcp.f32 %v1666_v35 }
 0x3ab   : > { %v2784_v10 = vpop.eup %2783 }
 0x3ac   : > { %v1672_v23 = vpop.xlane.xlu0 %1671  ;;  %v2786_v21 = vpop.eup %2785 }
 0x3ad   : > { %v1662_v22 = vpop.xlane.xlu1 %1661 }
 0x3ae   : > { %2799 = vrcp.f32 %v1662_v22 }
 0x3af   : > { %2801 = vrcp.f32 %v1672_v23 }
 0x3b0   : > { %v1668_v30 = vpop.xlane.xlu0 %1667 }
 0x3b1   : > { %v1674_v7 = vpop.xlane.xlu1 %1673  ;;  %2803 = vrcp.f32 %v1668_v30 }
 0x3b2   : > { %2805 = vrcp.f32 %v1674_v7 }
 0x3b4   : > { %v1676_v41 = vpop.xlane.xlu0 %1675 }
 0x3b5   : > { %v2564_v63 = vpop.f32.mrf.mxu1  ;;  %v1670_v42 = vpop.xlane.xlu1 %1669 }
 0x3b6   : > { %v1898_v48 = vmul.f32 %v2754_v45, %v2564_v63  ;;  %v2788_v45 = vpop.eup %2787  ;;  %2807 = vrcp.f32 %v1670_v42 }
 0x3b7   : > { %v1733_v62 = vpop.f32.mrf.mxu1 }
 0x3b8   : > { %1959 = vst [vmem:[%s3964_s26 + $0x10] sm:$0xff] %v1898_v48  ;;  %v1894_v44 = vmul.f32 %v2756_v29, %v1733_v62  ;;  %v2790_v29 = vpop.eup %2789  ;;  %v1680_v47 = vpop.xlane.xlu0 %1679 }
 0x3b9   : > { %v2565_v46 = vpop.f32.mrf.mxu1  ;;  %2809 = vrcp.f32 %v1680_v47 }
 0x3ba   : > { %1957 = vst [vmem:[%s3964_s26] sm:$0xff] %v1894_v44  ;;  %v1900_v17 = vmul.f32 %v2758_v57, %v2565_v46  ;;  %v2792_v44 = vpop.eup %2791  ;;  %v1678_v57 = vpop.xlane.xlu1 %1677  ;;  %2811 = vrcp.f32 %v1676_v41 }
 0x3bb   : > { %v1736_v36 = vpop.f32.mrf.mxu1 }
 0x3bc   : > { %1960 = vst [vmem:[%s3964_s26 + $0x18] sm:$0xff] %v1900_v17  ;;  %v1896_v28 = vmul.f32 %v2760_v26, %v1736_v36  ;;  %v2794_v26 = vpop.eup %2793 }
 0x3bd   : > { %v2796_v59 = vpop.eup %2795 }
 0x3be   : > { %1958 = vst [vmem:[%s3964_s26 + $0x8] sm:$0xff] %v1896_v28  ;;  %v2798_v14 = vpop.eup %2797 }
 0x3bf   : > { %v2800_v0 = vpop.eup %2799 }
 0x3c0   : > { %v2568_v50 = vpop.f32.mrf.mxu1 }
 0x3c1   : > { %v1906_v37 = vmul.f32 %v2762_v3, %v2568_v50 }
 0x3c2   : > { %v1749_v8 = vpop.f32.mrf.mxu1 }
 0x3c3   : > { %1963 = vst [vmem:[%s3964_s26 + $0x30] sm:$0xff] %v1906_v37  ;;  %v1902_v13 = vmul.f32 %v2764_v27, %v1749_v8  ;;  %v1682_v37 = vpop.xlane.xlu1 %1681 }
 0x3c4   : > { %v2569_v39 = vpop.f32.mrf.mxu1  ;;  %2813 = vrcp.f32 %v1682_v37 }
 0x3c5   : > { %1961 = vst [vmem:[%s3964_s26 + $0x20] sm:$0xff] %v1902_v13  ;;  %v1908_v16 = vmul.f32 %v2766_v58, %v2569_v39  ;;  %v2802_v39 = vpop.eup %2801  ;;  %2815 = vrcp.f32 %v1678_v57 }
 0x3c6   : > { %v1752_v49 = vpop.f32.mrf.mxu1 }
 0x3c7   : > { %1964 = vst [vmem:[%s3964_s26 + $0x38] sm:$0xff] %v1908_v16  ;;  %v1904_v19 = vmul.f32 %v2768_v43, %v1752_v49  ;;  %v2804_v49 = vpop.eup %2803 }
 0x3c8   : > { %v2572_v18 = vpop.f32.mrf.mxu1 }
 0x3c9   : > { %1962 = vst [vmem:[%s3964_s26 + $0x28] sm:$0xff] %v1904_v19  ;;  %v1914_v40 = vmul.f32 %v2770_v60, %v2572_v18  ;;  %v2806_v60 = vpop.eup %2805 }
 0x3ca   : > { %v1765_v33 = vpop.f32.mrf.mxu1 }
 0x3cb   : > { %1967 = vst [vmem:[%s3964_s26 + $0x50] sm:$0xff] %v1914_v40  ;;  %v1910_v53 = vmul.f32 %v2772_v6, %v1765_v33  ;;  %v2808_v40 = vpop.eup %2807 }
 0x3cc   : > { %v2573_v2 = vpop.f32.mrf.mxu1 }
 0x3cd   : > { %1965 = vst [vmem:[%s3964_s26 + $0x40] sm:$0xff] %v1910_v53  ;;  %v1916_v20 = vmul.f32 %v2774_v55, %v2573_v2  ;;  %v2810_v53 = vpop.eup %2809 }
 0x3ce   : > { %v1768_v31 = vpop.f32.mrf.mxu1  ;;  %v2812_v22 = vpop.eup %2811 }
 0x3cf   : > { %1968 = vst [vmem:[%s3964_s26 + $0x58] sm:$0xff] %v1916_v20  ;;  %v1912_v4 = vmul.f32 %v2776_v52, %v1768_v31 }
 0x3d0   : > { %v2576_v11 = vpop.f32.mrf.mxu1 }
 0x3d1   : > { %1966 = vst [vmem:[%s3964_s26 + $0x48] sm:$0xff] %v1912_v4  ;;  %v1922_v32 = vmul.f32 %v2778_v25, %v2576_v11  ;;  %v2814_v31 = vpop.eup %2813 }
 0x3d2   : > { %v1781_v1 = vpop.f32.mrf.mxu1  ;;  %v2816_v25 = vpop.eup %2815 }
 0x3d3   : > { %1971 = vst [vmem:[%s3964_s26 + $0x70] sm:$0xff] %v1922_v32  ;;  %v1918_v34 = vmul.f32 %v2780_v54, %v1781_v1 }
 0x3d4   : > { %v2577_v12 = vpop.f32.mrf.mxu1 }
 0x3d5   : > { %1969 = vst [vmem:[%s3964_s26 + $0x60] sm:$0xff] %v1918_v34  ;;  %v1924_v9 = vmul.f32 %v2782_v61, %v2577_v12 }
 0x3d6   : > { %v1784_v5 = vpop.f32.mrf.mxu1 }
 0x3d7   : > { %1972 = vst [vmem:[%s3964_s26 + $0x78] sm:$0xff] %v1924_v9  ;;  %v1920_v38 = vmul.f32 %v2784_v10, %v1784_v5 }
 0x3d8   : > { %v2596_v15 = vpop.f32.mrf.mxu1 }
 0x3d9   : > { %1970 = vst [vmem:[%s3964_s26 + $0x68] sm:$0xff] %v1920_v38  ;;  %v1930_v56 = vmul.f32 %v2786_v21, %v2596_v15 }
 0x3da   : > { %v1830_v63 = vpop.f32.mrf.mxu1 }
 0x3db   : > { %1975 = vst [vmem:[%s3964_s26 + $0x90] sm:$0xff] %v1930_v56  ;;  %v1926_v48 = vmul.f32 %v2788_v45, %v1830_v63 }
 0x3dc   : > { %v2597_v24 = vpop.f32.mrf.mxu1 }
 0x3dd   : > { %1973 = vst [vmem:[%s3964_s26 + $0x80] sm:$0xff] %v1926_v48  ;;  %v1932_v62 = vmul.f32 %v2790_v29, %v2597_v24 }
 0x3de   : > { %v1833_v46 = vpop.f32.mrf.mxu1 }
 0x3df   : > { %1976 = vst [vmem:[%s3964_s26 + $0x98] sm:$0xff] %v1932_v62  ;;  %v1928_v17 = vmul.f32 %v2792_v44, %v1833_v46 }
 0x3e0   : > { %v2600_v36 = vpop.f32.mrf.mxu1 }
 0x3e1   : > { %1974 = vst [vmem:[%s3964_s26 + $0x88] sm:$0xff] %v1928_v17  ;;  %v1938_v28 = vmul.f32 %v2794_v26, %v2600_v36 }
 0x3e2   : > { %v1846_v3 = vpop.f32.mrf.mxu1 }
 0x3e3   : > { %1979 = vst [vmem:[%s3964_s26 + $0xb0] sm:$0xff] %v1938_v28  ;;  %v1934_v50 = vmul.f32 %v2796_v59, %v1846_v3 }
 0x3e4   : > { %v2601_v27 = vpop.f32.mrf.mxu1 }
 0x3e5   : > { %1977 = vst [vmem:[%s3964_s26 + $0xa0] sm:$0xff] %v1934_v50  ;;  %v1940_v8 = vmul.f32 %v2798_v14, %v2601_v27 }
 0x3e6   : > { %v1849_v13 = vpop.f32.mrf.mxu1 }
 0x3e7   : > { %1980 = vst [vmem:[%s3964_s26 + $0xb8] sm:$0xff] %v1940_v8  ;;  %v1936_v58 = vmul.f32 %v2800_v0, %v1849_v13 }
 0x3e8   : > { %v2604_v16 = vpop.f32.mrf.mxu1 }
 0x3e9   : > { %1978 = vst [vmem:[%s3964_s26 + $0xa8] sm:$0xff] %v1936_v58  ;;  %v1946_v43 = vmul.f32 %v2802_v39, %v2604_v16 }
 0x3ea   : > { %v1862_v35 = vpop.f32.mrf.mxu1 }
 0x3eb   : > { %1983 = vst [vmem:[%s3964_s26 + $0xd0] sm:$0xff] %v1946_v43  ;;  %v1942_v19 = vmul.f32 %v2804_v49, %v1862_v35 }
 0x3ec   : > { %v2605_v18 = vpop.f32.mrf.mxu1 }
 0x3ed   : > { %1981 = vst [vmem:[%s3964_s26 + $0xc0] sm:$0xff] %v1942_v19  ;;  %v1948_v51 = vmul.f32 %v2806_v60, %v2605_v18 }
 0x3ee   : > { %v1865_v6 = vpop.f32.mrf.mxu1 }
 0x3ef   : > { %1984 = vst [vmem:[%s3964_s26 + $0xd8] sm:$0xff] %v1948_v51  ;;  %v1944_v33 = vmul.f32 %v2808_v40, %v1865_v6 }
 0x3f0   : > { %v2608_v55 = vpop.f32.mrf.mxu1 }
 0x3f1   : > { %1982 = vst [vmem:[%s3964_s26 + $0xc8] sm:$0xff] %v1944_v33  ;;  %v1954_v2 = vmul.f32 %v2810_v53, %v2608_v55 }
 0x3f2   : > { %v1878_v20 = vpop.f32.mrf.mxu1 }
 0x3f3   : > { %1987 = vst [vmem:[%s3964_s26 + $0xf0] sm:$0xff] %v1954_v2  ;;  %v1950_v52 = vmul.f32 %v2812_v22, %v1878_v20 }
 0x3f4   : > { %v2609_v23 = vpop.f32.mrf.mxu1 }
 0x3f5   : > { %1985 = vst [vmem:[%s3964_s26 + $0xe0] sm:$0xff] %v1950_v52  ;;  %v1956_v4 = vmul.f32 %v2814_v31, %v2609_v23 }
 0x3f6   : > { %v1881_v11 = vpop.f32.mrf.mxu1 }
 0x3f7   : > { %1988 = vst [vmem:[%s3964_s26 + $0xf8] sm:$0xff] %v1956_v4  ;;  %v1952_v32 = vmul.f32 %v2816_v25, %v1881_v11 }
 0x3f9   : > { %1986 = vst [vmem:[%s3964_s26 + $0xe8] sm:$0xff] %v1952_v32 }
 0x3fa   : > { %2886 = shalt.err (!%p2883_p9)
}
 0x3fb   : > { %s2887_s29 = scalar_lea.hbm %s4001_s15, 4096  ;;  %s2891_s14 = scalar_lea.hbm %s4053_s5, 8192 }
 0x3fc   : > { %p2888_p11 = scmp.ne.s32.totalorder %s4001_s15, %s2887_s29  ;;  %p2892_p8 = scmp.lt.s32.totalorder %s4001_s15, %s4053_s5 }
 0x3fd   : > { %p2893_p6 = scmp.lt.s32.totalorder %s2891_s14, %s2887_s29 }
 0x3fe   : > { %p2889_p3 = pnand %p2888_p11, %p4065_p12 }
 0x3ff   : > { %p2894_p13 = por %p2893_p6, %p2892_p8 }
 0x400   : > { %p2890_p5 = pneg %p2889_p3 }
 0x402   : > { %p2895_p1 = pnand %p2894_p13, %p2890_p5 }
 0x404   : > { %2898 = shalt.err (!%p2895_p1)
}
 0x405   : > { %s2948_s8 = smov 128   ;;  %s2949_s12 = smov 8  }
 0x406   : > { %2614 = dma.vmem_to_hbm [thread:$0]  (%p4065_p12), %s4003_s13, 4096, %s4001_s15, %s1990_s22, %s2948_s8, %s2948_s8, %s2949_s12  }
 0x407 PF: > { %s2019_s11 = sand.u32 1, %s2929_s18   ;;  %p4066_p7 = scmp.ne.s32.totalorder %s4060_s6, 0 }
 0x408   : > { %p4067_p10 = scmp.ge.s32.totalorder %s2941_s21, 2  ;;  %s2020_s23 = scalar_lea.sflag [#allocation4], %s2019_s11 }
 0x40a   : > { %p2624_p0 = pnand %p4067_p10, %p4066_p7 }
 0x40c   : > { %p2625_p2 = pneg %p2624_p0 }
 0x40e   : > { %2924 = dma.done.wait (%p2625_p2), %s2020_s23, 4096  }
 0x40f   : > { %2926 = vsyncadd (%p2625_p2), %s2020_s23, 4294963200  ;;  %p21_p4 = scmp.ge.s32.totalorder %s3005_s24, 4   ;;  %s4068_s18 = smov %s2933_s19 }
 0x410   : > { %s4069_s19 = smov %s2937_s20  ;;  %s4070_s20 = smov %s3017_s27 }
 0x411   : > { %s4071_s21 = smov %s3005_s24  ;;  %23 = sbr.rel (!%p21_p4) target bundleno = 7 (0x7), region = 103 }
 0x416   :  { %2025 = vsyncpa [#allocation3], 1 }
 0x417   :  { %2027 = vsyncpa [#allocation3 + $0x1], 1 }
 0x418   :  { %2028 = vsyncpa [#allocation6], 1 }
 0x419   :  { %2030 = vsyncpa [#allocation6 + $0x1], 1 }
 0x41a   :  { %2031 = vsyncpa [#allocation4], 1 }
 0x41b   :  { %2033 = vsyncpa [#allocation4 + $0x1], 1 }

</bundles_post_ra>
